<compile_context>
chip_gen: v7x
topology: tpu7x:2x2x1
jax: 0.10.0
libtpu: 0.0.40
codegen_flags: <defaults>
</compile_context>

<pallas_src>
import functools

import jax
import jax.numpy as jnp
from jax.experimental import pallas as pl
from jax.experimental.pallas import tpu as pltpu

EPS = 1e-5
LANES = 128


def _round_up(x, m):
    return (x + m - 1) // m * m


# ---------------------------------------------------------------------------
# Fused ResBlock kernel
# ---------------------------------------------------------------------------
def _resblock_kernel(xs_ref, w1_ref, sh1_ref, w2_ref, sh2_ref, wd_ref, shd_ref,
                     o_ref, act_ref, *, ksize, stride, pad):
    k, s = ksize, stride
    _, ho, wo, o_pad = o_ref.shape
    cin = xs_ref.shape[-1]
    hc = xs_ref.shape[1] // (s * s)          # rows per stride-phase
    m = ho * wo
    cdt = w1_ref.dtype                       # matmul operand dtype (bf16 by default)

    # Load the space-to-depth input block once, cast to matmul dtype once.
    xs_v = xs_ref[0].astype(cdt)             # (s*s*hc, wc, cin)

    def tap_window(kh, kw):
        # Output pixel (r, c) at tap (kh, kw) reads padded-x[s*r + kh, s*c + kw], which in
        # the space-to-depth layout is phase (kh % s, kw % s) at offset (kh//s, kw//s).
        ph = (kh % s) * s + (kw % s)
        r0 = ph * hc + kh // s
        c0 = kw // s
        return xs_v[r0:r0 + ho, c0:c0 + wo, :].reshape(m, cin)

    # ---- conv1 (kxk, stride s, pad) + BN1 (scale pre-folded into w1) + ReLU ----------
    acc = jnp.zeros((m, o_pad), jnp.float32)
    for kh in range(k):
        for kw in range(k):
            acc += jnp.dot(tap_window(kh, kw), w1_ref[kh * k + kw],
                           preferred_element_type=jnp.float32)
    y1 = jnp.maximum(acc + sh1_ref[...], 0.0)          # padded channels stay exactly 0

    # conv1 activation stays on-chip in a zero-padded VMEM scratch (conv2 halo),
    # already in the matmul dtype so conv2 taps need no per-tap cast.
    act_ref[...] = jnp.zeros(act_ref.shape, act_ref.dtype)
    act_ref[pad:pad + ho, pad:pad + wo, :] = (
        y1.reshape(ho, wo, o_pad).astype(act_ref.dtype))

    # ---- fused downsample shortcut: 1x1 conv (stride s, no padding) + BN_d -----------
    # Its input is just one phase/window of xs (padded-x index s*r + pad).
    phd = (pad % s) * s + (pad % s)
    rd = pad // s
    idn_in = xs_v[phd * hc + rd:phd * hc + rd + ho, rd:rd + wo, :].reshape(m, cin)
    idn = jnp.dot(idn_in, wd_ref[...], preferred_element_type=jnp.float32) + shd_ref[...]

    # ---- conv2 (kxk, stride 1, pad) + BN2 + identity + ReLU --------------------------
    acc2 = jnp.zeros((m, o_pad), jnp.float32)
    for kh in range(k):
        for kw in range(k):
            win = act_ref[kh:kh + ho, kw:kw + wo, :].reshape(m, o_pad)
            acc2 += jnp.dot(win, w2_ref[kh * k + kw],
                            preferred_element_type=jnp.float32)
    out = jnp.maximum(acc2 + sh2_ref[...] + idn, 0.0)
    o_ref[...] = out.reshape(1, ho, wo, o_pad).astype(o_ref.dtype)


# ---------------------------------------------------------------------------
# Host-side glue
# ---------------------------------------------------------------------------
def fold_bn(conv_bias, gamma, beta, mean, var):
    scale = gamma / jnp.sqrt(var + EPS)
    shift = beta + (conv_bias - mean) * scale
    return scale, shift


def _space_to_depth(x_pad, s):
    """(N, Hp, Wp, C) -> (N, s*s*ceil(Hp/s), ceil(Wp/s), C).

    Row (a*s + b)*Hc + r, column c holds x_pad[n, s*r + a, s*c + b, :].
    For s == 1 this is the identity layout.
    """
    n, hp, wp, c = x_pad.shape
    hps, wps = _round_up(hp, s), _round_up(wp, s)
    hc, wc = hps // s, wps // s
    x_pad = jnp.pad(x_pad, ((0, 0), (0, hps - hp), (0, wps - wp), (0, 0)))
    x = x_pad.reshape(n, hc, s, wc, s, c)
    x = jnp.transpose(x, (0, 2, 4, 1, 3, 5))           # (n, a, b, hc, wc, c)
    return x.reshape(n, s * s * hc, wc, c)


def _fold_weight(w_oikk, scale, o_pad, dtype, c_pad=None):
    """(O, C, K, K) -> (K*K, C_pad, O_pad) with BN scale folded in, zero-padded, cast."""
    o, c, kh, kw = w_oikk.shape
    w = jnp.transpose(w_oikk, (2, 3, 1, 0)).reshape(kh * kw, c, o) * scale
    c_pad = c if c_pad is None else c_pad
    w = jnp.pad(w, ((0, 0), (0, c_pad - c), (0, o_pad - o)))
    return w.astype(dtype)


def _pad_shift(shift, o_pad):
    return jnp.pad(shift, (0, o_pad - shift.shape[0])).reshape(1, o_pad).astype(jnp.float32)


def resblock_forward(x_nchw, params, stride, *, use_bf16=True):
    n, cin, h, w = x_nchw.shape
    cout, _, k, k2 = params["w1"].shape
    # The module hard-codes padding=1; residual shapes only line up for 3x3 convs.
    assert k == k2 == 3, (k, k2)
    pad, s = 1, stride
    ho = (h + 2 * pad - k) // s + 1
    wo = (w + 2 * pad - k) // s + 1
    o_pad = _round_up(cout, LANES)
    wdt = jnp.bfloat16 if use_bf16 else jnp.float32

    # NHWC, zero-pad spatially, space-to-depth by the stride (fused-im2col input form).
    # x itself stays f32 (read exactly once); matmul operands are cast once in-kernel.
    x_nhwc = jnp.transpose(x_nchw, (0, 2, 3, 1)).astype(jnp.float32)
    xs = _space_to_depth(jnp.pad(x_nhwc, ((0, 0), (pad, pad), (pad, pad), (0, 0))), s)

    # Fold conv bias + eval-mode BN: scale -> weights, shift -> additive epilogue.
    s1, sh1 = fold_bn(params["b1c"], *params["bn1"])
    s2, sh2 = fold_bn(params["b2c"], *params["bn2"])
    w1 = _fold_weight(params["w1"], s1, o_pad, wdt)
    w2 = _fold_weight(params["w2"], s2, o_pad, wdt, c_pad=o_pad)
    if params.get("wd") is not None:
        sd, shd = fold_bn(params["bdc"], *params["bnd"])
        wd = _fold_weight(params["wd"], sd, o_pad, wdt)[0]
    else:
        # Identity shortcut (cin == cout, stride == 1): reuse the same path with a 1x1
        # identity "conv" weight and zero shift.
        assert cin == cout and s == 1
        wd = jnp.pad(jnp.eye(cin, dtype=jnp.float32),
                     ((0, 0), (0, o_pad - cout))).astype(wdt)
        shd = jnp.zeros((cout,), jnp.float32)
    sh1p, sh2p, shdp = (_pad_shift(v, o_pad) for v in (sh1, sh2, shd))

    # Explicit VMEM budget (double-buffered per-image input/output + resident weights +
    # scratch) with headroom, capped under v7x's 64 MiB per-core VMEM.
    witem = jnp.dtype(wdt).itemsize
    xs_bytes = xs.shape[1] * xs.shape[2] * xs.shape[3] * 4
    out_bytes = ho * wo * o_pad * 4
    w_bytes = (w1.size + w2.size + wd.size) * witem + 3 * o_pad * 4
    scratch_bytes = (ho + 2 * pad) * (wo + 2 * pad) * o_pad * witem
    vmem_limit = int(min(max(2 * (xs_bytes + out_bytes) + 2 * w_bytes + scratch_bytes
                             + (4 << 20), 8 << 20), 60 << 20))

    kernel = functools.partial(_resblock_kernel, ksize=k, stride=s, pad=pad)

    out = pl.pallas_call(
        kernel,
        out_shape=jax.ShapeDtypeStruct((n, ho, wo, o_pad), jnp.float32),
        grid_spec=pltpu.PrefetchScalarGridSpec(
            num_scalar_prefetch=0,
            grid=(n,),
            in_specs=[
                # per-image space-to-depth input block
                pl.BlockSpec((1,) + xs.shape[1:], lambda i: (i, 0, 0, 0)),
                # grid-invariant operands (weights / shifts) stay resident in VMEM
                pl.BlockSpec((k * k, cin, o_pad), lambda i: (0, 0, 0)),
                pl.BlockSpec((1, o_pad), lambda i: (0, 0)),
                pl.BlockSpec((k * k, o_pad, o_pad), lambda i: (0, 0, 0)),
                pl.BlockSpec((1, o_pad), lambda i: (0, 0)),
                pl.BlockSpec((cin, o_pad), lambda i: (0, 0)),
                pl.BlockSpec((1, o_pad), lambda i: (0, 0)),
            ],
            out_specs=pl.BlockSpec((1, ho, wo, o_pad), lambda i: (i, 0, 0, 0)),
            scratch_shapes=[
                pltpu.VMEM((ho + 2 * pad, wo + 2 * pad, o_pad), wdt),
            ],
        ),
        compiler_params=pltpu.CompilerParams(
            dimension_semantics=("parallel",),
            vmem_limit_bytes=vmem_limit,
        ),
    )(xs, w1, sh1p, w2, sh2p, wd, shdp)

    out = out[:, :, :, :cout]                          # strip lane padding
    return jnp.transpose(out, (0, 3, 1, 2))            # NHWC -> NCHW


# ---------------------------------------------------------------------------
# Pure-JAX references (lax.conv), for correctness checking
# ---------------------------------------------------------------------------
def ref_resblock(x, params, stride):
    def conv(x, w, b, s, pad):
        y = jax.lax.conv_general_dilated(
            x, w, (s, s), [(pad, pad), (pad, pad)],
            dimension_numbers=("NCHW", "OIHW", "NCHW"))
        return y + b[None, :, None, None]

    def bn(x, g, b, m, v):
        return (x - m[None, :, None, None]) / jnp.sqrt(v[None, :, None, None] + EPS) \
            * g[None, :, None, None] + b[None, :, None, None]

    out = conv(x, params["w1"], params["b1c"], stride, 1)
    out = jnp.maximum(bn(out, *params["bn1"]), 0.0)
    out = conv(out, params["w2"], params["b2c"], 1, 1)
    out = bn(out, *params["bn2"])
    ident = bn(conv(x, params["wd"], params["bdc"], stride, 0), *params["bnd"])
    return jnp.maximum(out + ident, 0.0)


def ref_resblock_matched(x, params, stride, use_bf16=True):
    """Reference applying the same bf16 rounding of matmul operands as the kernel."""
    def rnd(v):
        return v.astype(jnp.bfloat16).astype(jnp.float32) if use_bf16 else v

    def conv(x, w, s, pad):
        return jax.lax.conv_general_dilated(
            x, w, (s, s), [(pad, pad), (pad, pad)],
            dimension_numbers=("NCHW", "OIHW", "NCHW"))

    s1, sh1 = fold_bn(params["b1c"], *params["bn1"])
    s2, sh2 = fold_bn(params["b2c"], *params["bn2"])
    sd, shd = fold_bn(params["bdc"], *params["bnd"])
    xb = rnd(x)
    out = conv(xb, rnd(params["w1"] * s1[:, None, None, None]), stride, 1) \
        + sh1[None, :, None, None]
    out = rnd(jnp.maximum(out, 0.0))
    out = conv(out, rnd(params["w2"] * s2[:, None, None, None]), 1, 1) \
        + sh2[None, :, None, None]
    idn = conv(xb, rnd(params["wd"] * sd[:, None, None, None]), stride, 0) \
        + shd[None, :, None, None]
    return jnp.maximum(out + idn, 0.0)


# ---------------------------------------------------------------------------
def make_params(key, cin, cout, k):
    ks = jax.random.split(key, 12)

    def bn_params(k1, k2, k3, k4, c):
        gamma = jax.random.uniform(k1, (c,), jnp.float32, 0.5, 1.5)
        beta = jax.random.normal(k2, (c,), jnp.float32) * 0.1
        mean = jax.random.normal(k3, (c,), jnp.float32) * 0.1
        var = jax.random.uniform(k4, (c,), jnp.float32, 0.5, 1.5)
        return (gamma, beta, mean, var)

    return {
        "w1": jax.random.normal(ks[0], (cout, cin, k, k), jnp.float32) * 0.1,
        "b1c": jax.random.normal(ks[1], (cout,), jnp.float32) * 0.1,
        "bn1": bn_params(ks[2], ks[3], ks[4], ks[5], cout),
        "w2": jax.random.normal(ks[6], (cout, cout, k, k), jnp.float32) * 0.1,
        "b2c": jax.random.normal(ks[7], (cout,), jnp.float32) * 0.1,
        "bn2": bn_params(ks[8], ks[9], ks[10], ks[11], cout),
        "wd": jax.random.normal(jax.random.fold_in(key, 100), (cout, cin, 1, 1), jnp.float32) * 0.1,
        "bdc": jax.random.normal(jax.random.fold_in(key, 101), (cout,), jnp.float32) * 0.1,
        "bnd": bn_params(jax.random.fold_in(key, 102), jax.random.fold_in(key, 103),
                         jax.random.fold_in(key, 104), jax.random.fold_in(key, 105), cout),
    }


if __name__ == "__main__":
    key = jax.random.PRNGKey(0)
    kx, kp = jax.random.split(key)

    # ResBlock(in_channels=4, out_channels=8, kernel_size=3, stride=2) -> downsample active
    N, CIN, COUT, H, W, KSIZE, STRIDE = 2, 4, 8, 16, 16, 3, 2
    x = jax.random.normal(kx, (N, CIN, H, W), jnp.float32)
    params = make_params(kp, CIN, COUT, KSIZE)

    fwd_bf16 = jax.jit(functools.partial(resblock_forward, stride=STRIDE, use_bf16=True))
    out = jax.block_until_ready(fwd_bf16(x, params))

    ref32 = jax.block_until_ready(ref_resblock(x, params, STRIDE))
    assert out.shape == ref32.shape, (out.shape, ref32.shape)

    # Tight check vs a reference that applies the same bf16 rounding as the kernel.
    ref_bf = ref_resblock_matched(x, params, STRIDE, use_bf16=True)
    err_bf = float(jnp.max(jnp.abs(out - ref_bf)))
    assert jnp.allclose(out, ref_bf, rtol=1e-4, atol=1e-4), err_bf

    # Sanity check vs the pure-f32 reference (bf16 matmul operands => loose tolerance).
    err32 = float(jnp.max(jnp.abs(out - ref32)))
    assert jnp.allclose(out, ref32, rtol=5e-2, atol=5e-2), err32

    # Full-f32 mode must match the f32 reference tightly.
    fwd_f32 = jax.jit(functools.partial(resblock_forward, stride=STRIDE, use_bf16=False))
    out32 = jax.block_until_ready(fwd_f32(x, params))
    assert jnp.allclose(out32, ref32, rtol=1e-4, atol=1e-4), \
        float(jnp.max(jnp.abs(out32 - ref32)))

    print("KERNEL_OK")
</pallas_src>

<mosaic_0001>
module attributes {stable_mosaic.version = 11 : i64} {
  func.func @_resblock_kernel(%arg0: i32, %arg1: memref<1x36x9x4xf32, #tpu.memory_space<vmem>>, %arg2: memref<9x4x128xbf16, #tpu.memory_space<vmem>>, %arg3: memref<1x128xf32, #tpu.memory_space<vmem>>, %arg4: memref<9x128x128xbf16, #tpu.memory_space<vmem>>, %arg5: memref<1x128xf32, #tpu.memory_space<vmem>>, %arg6: memref<4x128xbf16, #tpu.memory_space<vmem>>, %arg7: memref<1x128xf32, #tpu.memory_space<vmem>>, %arg8: memref<1x8x8x128xf32, #tpu.memory_space<vmem>>, %arg9: memref<10x10x128xbf16, #tpu.memory_space<vmem>>) attributes {dimension_semantics = [#tpu.dimension_semantics<parallel>], iteration_bounds = array<i64: 2>, scalar_prefetch = 0 : i64, scratch_operands = 1 : i64, tpu.core_type = #tpu.core_type<tc>, window_params = [{transform_indices = @transform_0, window_bounds = array<i64: 1, 36, 9, 4>}, {pipeline_mode = #tpu.pipeline_mode<synchronous>, transform_indices = @transform_1, window_bounds = array<i64: 9, 4, 128>}, {pipeline_mode = #tpu.pipeline_mode<synchronous>, transform_indices = @transform_2, window_bounds = array<i64: 1, 128>}, {pipeline_mode = #tpu.pipeline_mode<synchronous>, transform_indices = @transform_3, window_bounds = array<i64: 9, 128, 128>}, {pipeline_mode = #tpu.pipeline_mode<synchronous>, transform_indices = @transform_4, window_bounds = array<i64: 1, 128>}, {pipeline_mode = #tpu.pipeline_mode<synchronous>, transform_indices = @transform_5, window_bounds = array<i64: 4, 128>}, {pipeline_mode = #tpu.pipeline_mode<synchronous>, transform_indices = @transform_6, window_bounds = array<i64: 1, 128>}, {transform_indices = @transform_7, window_bounds = array<i64: 1, 8, 8, 128>}]} {
    %c0 = arith.constant 0 : index
    %c0_0 = arith.constant 0 : index
    %c0_1 = arith.constant 0 : index
    %c0_2 = arith.constant 0 : index
    %0 = vector.load %arg1[%c0, %c0_0, %c0_1, %c0_2] : memref<1x36x9x4xf32, #tpu.memory_space<vmem>>, vector<1x36x9x4xf32>
    %1 = vector.shape_cast %0 : vector<1x36x9x4xf32> to vector<36x9x4xf32>
    %2 = arith.truncf %1 : vector<36x9x4xf32> to vector<36x9x4xbf16>
    %cst = arith.constant 0.000000e+00 : f32
    %3 = vector.broadcast %cst : f32 to vector<64x128xf32>
    %4 = vector.extract_strided_slice %2 {offsets = [0, 0, 0], sizes = [8, 8, 4], strides = [1, 1, 1]} : vector<36x9x4xbf16> to vector<8x8x4xbf16>
    %5 = vector.shape_cast %4 : vector<8x8x4xbf16> to vector<64x4xbf16>
    %c0_3 = arith.constant 0 : index
    %c0_4 = arith.constant 0 : index
    %c0_5 = arith.constant 0 : index
    %6 = vector.load %arg2[%c0_3, %c0_4, %c0_5] : memref<9x4x128xbf16, #tpu.memory_space<vmem>>, vector<1x4x128xbf16>
    %7 = vector.shape_cast %6 : vector<1x4x128xbf16> to vector<4x128xbf16>
    %cst_6 = arith.constant dense<0.000000e+00> : vector<64x128xf32>
    %8 = tpu.matmul %5, %7, %cst_6 {dimension_numbers = #tpu.dot_dimension_numbers<[1], [0], [0], [1], [0, 0, 1, 1], [], []>} : vector<64x4xbf16>, vector<4x128xbf16>, vector<64x128xf32> -> vector<64x128xf32>
    %9 = arith.addf %3, %8 : vector<64x128xf32>
    %10 = vector.extract_strided_slice %2 {offsets = [9, 0, 0], sizes = [8, 8, 4], strides = [1, 1, 1]} : vector<36x9x4xbf16> to vector<8x8x4xbf16>
    %11 = vector.shape_cast %10 : vector<8x8x4xbf16> to vector<64x4xbf16>
    %c1 = arith.constant 1 : index
    %c0_7 = arith.constant 0 : index
    %c0_8 = arith.constant 0 : index
    %12 = vector.load %arg2[%c1, %c0_7, %c0_8] : memref<9x4x128xbf16, #tpu.memory_space<vmem>>, vector<1x4x128xbf16>
    %13 = vector.shape_cast %12 : vector<1x4x128xbf16> to vector<4x128xbf16>
    %cst_9 = arith.constant dense<0.000000e+00> : vector<64x128xf32>
    %14 = tpu.matmul %11, %13, %cst_9 {dimension_numbers = #tpu.dot_dimension_numbers<[1], [0], [0], [1], [0, 0, 1, 1], [], []>} : vector<64x4xbf16>, vector<4x128xbf16>, vector<64x128xf32> -> vector<64x128xf32>
    %15 = arith.addf %9, %14 : vector<64x128xf32>
    %16 = vector.extract_strided_slice %2 {offsets = [0, 1, 0], sizes = [8, 8, 4], strides = [1, 1, 1]} : vector<36x9x4xbf16> to vector<8x8x4xbf16>
    %17 = vector.shape_cast %16 : vector<8x8x4xbf16> to vector<64x4xbf16>
    %c2 = arith.constant 2 : index
    %c0_10 = arith.constant 0 : index
    %c0_11 = arith.constant 0 : index
    %18 = vector.load %arg2[%c2, %c0_10, %c0_11] : memref<9x4x128xbf16, #tpu.memory_space<vmem>>, vector<1x4x128xbf16>
    %19 = vector.shape_cast %18 : vector<1x4x128xbf16> to vector<4x128xbf16>
    %cst_12 = arith.constant dense<0.000000e+00> : vector<64x128xf32>
    %20 = tpu.matmul %17, %19, %cst_12 {dimension_numbers = #tpu.dot_dimension_numbers<[1], [0], [0], [1], [0, 0, 1, 1], [], []>} : vector<64x4xbf16>, vector<4x128xbf16>, vector<64x128xf32> -> vector<64x128xf32>
    %21 = arith.addf %15, %20 : vector<64x128xf32>
    %22 = vector.extract_strided_slice %2 {offsets = [18, 0, 0], sizes = [8, 8, 4], strides = [1, 1, 1]} : vector<36x9x4xbf16> to vector<8x8x4xbf16>
    %23 = vector.shape_cast %22 : vector<8x8x4xbf16> to vector<64x4xbf16>
    %c3 = arith.constant 3 : index
    %c0_13 = arith.constant 0 : index
    %c0_14 = arith.constant 0 : index
    %24 = vector.load %arg2[%c3, %c0_13, %c0_14] : memref<9x4x128xbf16, #tpu.memory_space<vmem>>, vector<1x4x128xbf16>
    %25 = vector.shape_cast %24 : vector<1x4x128xbf16> to vector<4x128xbf16>
    %cst_15 = arith.constant dense<0.000000e+00> : vector<64x128xf32>
    %26 = tpu.matmul %23, %25, %cst_15 {dimension_numbers = #tpu.dot_dimension_numbers<[1], [0], [0], [1], [0, 0, 1, 1], [], []>} : vector<64x4xbf16>, vector<4x128xbf16>, vector<64x128xf32> -> vector<64x128xf32>
    %27 = arith.addf %21, %26 : vector<64x128xf32>
    %28 = vector.extract_strided_slice %2 {offsets = [27, 0, 0], sizes = [8, 8, 4], strides = [1, 1, 1]} : vector<36x9x4xbf16> to vector<8x8x4xbf16>
    %29 = vector.shape_cast %28 : vector<8x8x4xbf16> to vector<64x4xbf16>
    %c4 = arith.constant 4 : index
    %c0_16 = arith.constant 0 : index
    %c0_17 = arith.constant 0 : index
    %30 = vector.load %arg2[%c4, %c0_16, %c0_17] : memref<9x4x128xbf16, #tpu.memory_space<vmem>>, vector<1x4x128xbf16>
    %31 = vector.shape_cast %30 : vector<1x4x128xbf16> to vector<4x128xbf16>
    %cst_18 = arith.constant dense<0.000000e+00> : vector<64x128xf32>
    %32 = tpu.matmul %29, %31, %cst_18 {dimension_numbers = #tpu.dot_dimension_numbers<[1], [0], [0], [1], [0, 0, 1, 1], [], []>} : vector<64x4xbf16>, vector<4x128xbf16>, vector<64x128xf32> -> vector<64x128xf32>
    %33 = arith.addf %27, %32 : vector<64x128xf32>
    %34 = vector.extract_strided_slice %2 {offsets = [18, 1, 0], sizes = [8, 8, 4], strides = [1, 1, 1]} : vector<36x9x4xbf16> to vector<8x8x4xbf16>
    %35 = vector.shape_cast %34 : vector<8x8x4xbf16> to vector<64x4xbf16>
    %c5 = arith.constant 5 : index
    %c0_19 = arith.constant 0 : index
    %c0_20 = arith.constant 0 : index
    %36 = vector.load %arg2[%c5, %c0_19, %c0_20] : memref<9x4x128xbf16, #tpu.memory_space<vmem>>, vector<1x4x128xbf16>
    %37 = vector.shape_cast %36 : vector<1x4x128xbf16> to vector<4x128xbf16>
    %cst_21 = arith.constant dense<0.000000e+00> : vector<64x128xf32>
    %38 = tpu.matmul %35, %37, %cst_21 {dimension_numbers = #tpu.dot_dimension_numbers<[1], [0], [0], [1], [0, 0, 1, 1], [], []>} : vector<64x4xbf16>, vector<4x128xbf16>, vector<64x128xf32> -> vector<64x128xf32>
    %39 = arith.addf %33, %38 : vector<64x128xf32>
    %40 = vector.extract_strided_slice %2 {offsets = [1, 0, 0], sizes = [8, 8, 4], strides = [1, 1, 1]} : vector<36x9x4xbf16> to vector<8x8x4xbf16>
    %41 = vector.shape_cast %40 : vector<8x8x4xbf16> to vector<64x4xbf16>
    %c6 = arith.constant 6 : index
    %c0_22 = arith.constant 0 : index
    %c0_23 = arith.constant 0 : index
    %42 = vector.load %arg2[%c6, %c0_22, %c0_23] : memref<9x4x128xbf16, #tpu.memory_space<vmem>>, vector<1x4x128xbf16>
    %43 = vector.shape_cast %42 : vector<1x4x128xbf16> to vector<4x128xbf16>
    %cst_24 = arith.constant dense<0.000000e+00> : vector<64x128xf32>
    %44 = tpu.matmul %41, %43, %cst_24 {dimension_numbers = #tpu.dot_dimension_numbers<[1], [0], [0], [1], [0, 0, 1, 1], [], []>} : vector<64x4xbf16>, vector<4x128xbf16>, vector<64x128xf32> -> vector<64x128xf32>
    %45 = arith.addf %39, %44 : vector<64x128xf32>
    %46 = vector.extract_strided_slice %2 {offsets = [10, 0, 0], sizes = [8, 8, 4], strides = [1, 1, 1]} : vector<36x9x4xbf16> to vector<8x8x4xbf16>
    %47 = vector.shape_cast %46 : vector<8x8x4xbf16> to vector<64x4xbf16>
    %c7 = arith.constant 7 : index
    %c0_25 = arith.constant 0 : index
    %c0_26 = arith.constant 0 : index
    %48 = vector.load %arg2[%c7, %c0_25, %c0_26] : memref<9x4x128xbf16, #tpu.memory_space<vmem>>, vector<1x4x128xbf16>
    %49 = vector.shape_cast %48 : vector<1x4x128xbf16> to vector<4x128xbf16>
    %cst_27 = arith.constant dense<0.000000e+00> : vector<64x128xf32>
    %50 = tpu.matmul %47, %49, %cst_27 {dimension_numbers = #tpu.dot_dimension_numbers<[1], [0], [0], [1], [0, 0, 1, 1], [], []>} : vector<64x4xbf16>, vector<4x128xbf16>, vector<64x128xf32> -> vector<64x128xf32>
    %51 = arith.addf %45, %50 : vector<64x128xf32>
    %52 = vector.extract_strided_slice %2 {offsets = [1, 1, 0], sizes = [8, 8, 4], strides = [1, 1, 1]} : vector<36x9x4xbf16> to vector<8x8x4xbf16>
    %53 = vector.shape_cast %52 : vector<8x8x4xbf16> to vector<64x4xbf16>
    %c8 = arith.constant 8 : index
    %c0_28 = arith.constant 0 : index
    %c0_29 = arith.constant 0 : index
    %54 = vector.load %arg2[%c8, %c0_28, %c0_29] : memref<9x4x128xbf16, #tpu.memory_space<vmem>>, vector<1x4x128xbf16>
    %55 = vector.shape_cast %54 : vector<1x4x128xbf16> to vector<4x128xbf16>
    %cst_30 = arith.constant dense<0.000000e+00> : vector<64x128xf32>
    %56 = tpu.matmul %53, %55, %cst_30 {dimension_numbers = #tpu.dot_dimension_numbers<[1], [0], [0], [1], [0, 0, 1, 1], [], []>} : vector<64x4xbf16>, vector<4x128xbf16>, vector<64x128xf32> -> vector<64x128xf32>
    %57 = arith.addf %51, %56 : vector<64x128xf32>
    %c0_31 = arith.constant 0 : index
    %c0_32 = arith.constant 0 : index
    %58 = vector.load %arg3[%c0_31, %c0_32] : memref<1x128xf32, #tpu.memory_space<vmem>>, vector<1x128xf32>
    %59 = vector.broadcast %58 : vector<1x128xf32> to vector<64x128xf32>
    %60 = arith.addf %57, %59 : vector<64x128xf32>
    %cst_33 = arith.constant 0.000000e+00 : f32
    %61 = vector.broadcast %cst_33 : f32 to vector<64x128xf32>
    %62 = arith.maximumf %60, %61 : vector<64x128xf32>
    %cst_34 = arith.constant 0.000000e+00 : bf16
    %63 = vector.broadcast %cst_34 : bf16 to vector<10x10x128xbf16>
    %c0_35 = arith.constant 0 : index
    %c0_36 = arith.constant 0 : index
    %c0_37 = arith.constant 0 : index
    %64 = vector.load %arg9[%c0_35, %c0_36, %c0_37] : memref<10x10x128xbf16, #tpu.memory_space<vmem>>, vector<10x10x128xbf16>
    tpu.vector_store %arg9[%c0_35, %c0_36, %c0_37], %63 {strides = array<i32>} : memref<10x10x128xbf16, #tpu.memory_space<vmem>>, vector<10x10x128xbf16>,
    %65 = vector.shape_cast %62 : vector<64x128xf32> to vector<8x8x128xf32>
    %66 = arith.truncf %65 : vector<8x8x128xf32> to vector<8x8x128xbf16>
    %c1_38 = arith.constant 1 : index
    %c1_39 = arith.constant 1 : index
    %c0_40 = arith.constant 0 : index
    %67 = vector.load %arg9[%c1_38, %c1_39, %c0_40] : memref<10x10x128xbf16, #tpu.memory_space<vmem>>, vector<8x8x128xbf16>
    tpu.vector_store %arg9[%c1_38, %c1_39, %c0_40], %66 {strides = array<i32>} : memref<10x10x128xbf16, #tpu.memory_space<vmem>>, vector<8x8x128xbf16>,
    %68 = vector.extract_strided_slice %2 {offsets = [27, 0, 0], sizes = [8, 8, 4], strides = [1, 1, 1]} : vector<36x9x4xbf16> to vector<8x8x4xbf16>
    %69 = vector.shape_cast %68 : vector<8x8x4xbf16> to vector<64x4xbf16>
    %c0_41 = arith.constant 0 : index
    %c0_42 = arith.constant 0 : index
    %70 = vector.load %arg6[%c0_41, %c0_42] : memref<4x128xbf16, #tpu.memory_space<vmem>>, vector<4x128xbf16>
    %cst_43 = arith.constant dense<0.000000e+00> : vector<64x128xf32>
    %71 = tpu.matmul %69, %70, %cst_43 {dimension_numbers = #tpu.dot_dimension_numbers<[1], [0], [0], [1], [0, 0, 1, 1], [], []>} : vector<64x4xbf16>, vector<4x128xbf16>, vector<64x128xf32> -> vector<64x128xf32>
    %c0_44 = arith.constant 0 : index
    %c0_45 = arith.constant 0 : index
    %72 = vector.load %arg7[%c0_44, %c0_45] : memref<1x128xf32, #tpu.memory_space<vmem>>, vector<1x128xf32>
    %73 = vector.broadcast %72 : vector<1x128xf32> to vector<64x128xf32>
    %74 = arith.addf %71, %73 : vector<64x128xf32>
    %cst_46 = arith.constant 0.000000e+00 : f32
    %75 = vector.broadcast %cst_46 : f32 to vector<64x128xf32>
    %c0_47 = arith.constant 0 : index
    %c0_48 = arith.constant 0 : index
    %c0_49 = arith.constant 0 : index
    %76 = vector.load %arg9[%c0_47, %c0_48, %c0_49] : memref<10x10x128xbf16, #tpu.memory_space<vmem>>, vector<8x8x128xbf16>
    %77 = vector.shape_cast %76 : vector<8x8x128xbf16> to vector<64x128xbf16>
    %c0_50 = arith.constant 0 : index
    %c0_51 = arith.constant 0 : index
    %c0_52 = arith.constant 0 : index
    %78 = vector.load %arg4[%c0_50, %c0_51, %c0_52] : memref<9x128x128xbf16, #tpu.memory_space<vmem>>, vector<1x128x128xbf16>
    %79 = vector.shape_cast %78 : vector<1x128x128xbf16> to vector<128x128xbf16>
    %cst_53 = arith.constant dense<0.000000e+00> : vector<64x128xf32>
    %80 = tpu.matmul %77, %79, %cst_53 {dimension_numbers = #tpu.dot_dimension_numbers<[1], [0], [0], [1], [0, 0, 1, 1], [], []>} : vector<64x128xbf16>, vector<128x128xbf16>, vector<64x128xf32> -> vector<64x128xf32>
    %81 = arith.addf %75, %80 : vector<64x128xf32>
    %c0_54 = arith.constant 0 : index
    %c1_55 = arith.constant 1 : index
    %c0_56 = arith.constant 0 : index
    %82 = vector.load %arg9[%c0_54, %c1_55, %c0_56] : memref<10x10x128xbf16, #tpu.memory_space<vmem>>, vector<8x8x128xbf16>
    %83 = vector.shape_cast %82 : vector<8x8x128xbf16> to vector<64x128xbf16>
    %c1_57 = arith.constant 1 : index
    %c0_58 = arith.constant 0 : index
    %c0_59 = arith.constant 0 : index
    %84 = vector.load %arg4[%c1_57, %c0_58, %c0_59] : memref<9x128x128xbf16, #tpu.memory_space<vmem>>, vector<1x128x128xbf16>
    %85 = vector.shape_cast %84 : vector<1x128x128xbf16> to vector<128x128xbf16>
    %cst_60 = arith.constant dense<0.000000e+00> : vector<64x128xf32>
    %86 = tpu.matmul %83, %85, %cst_60 {dimension_numbers = #tpu.dot_dimension_numbers<[1], [0], [0], [1], [0, 0, 1, 1], [], []>} : vector<64x128xbf16>, vector<128x128xbf16>, vector<64x128xf32> -> vector<64x128xf32>
    %87 = arith.addf %81, %86 : vector<64x128xf32>
    %c0_61 = arith.constant 0 : index
    %c2_62 = arith.constant 2 : index
    %c0_63 = arith.constant 0 : index
    %88 = vector.load %arg9[%c0_61, %c2_62, %c0_63] : memref<10x10x128xbf16, #tpu.memory_space<vmem>>, vector<8x8x128xbf16>
    %89 = vector.shape_cast %88 : vector<8x8x128xbf16> to vector<64x128xbf16>
    %c2_64 = arith.constant 2 : index
    %c0_65 = arith.constant 0 : index
    %c0_66 = arith.constant 0 : index
    %90 = vector.load %arg4[%c2_64, %c0_65, %c0_66] : memref<9x128x128xbf16, #tpu.memory_space<vmem>>, vector<1x128x128xbf16>
    %91 = vector.shape_cast %90 : vector<1x128x128xbf16> to vector<128x128xbf16>
    %cst_67 = arith.constant dense<0.000000e+00> : vector<64x128xf32>
    %92 = tpu.matmul %89, %91, %cst_67 {dimension_numbers = #tpu.dot_dimension_numbers<[1], [0], [0], [1], [0, 0, 1, 1], [], []>} : vector<64x128xbf16>, vector<128x128xbf16>, vector<64x128xf32> -> vector<64x128xf32>
    %93 = arith.addf %87, %92 : vector<64x128xf32>
    %c1_68 = arith.constant 1 : index
    %c0_69 = arith.constant 0 : index
    %c0_70 = arith.constant 0 : index
    %94 = vector.load %arg9[%c1_68, %c0_69, %c0_70] : memref<10x10x128xbf16, #tpu.memory_space<vmem>>, vector<8x8x128xbf16>
    %95 = vector.shape_cast %94 : vector<8x8x128xbf16> to vector<64x128xbf16>
    %c3_71 = arith.constant 3 : index
    %c0_72 = arith.constant 0 : index
    %c0_73 = arith.constant 0 : index
    %96 = vector.load %arg4[%c3_71, %c0_72, %c0_73] : memref<9x128x128xbf16, #tpu.memory_space<vmem>>, vector<1x128x128xbf16>
    %97 = vector.shape_cast %96 : vector<1x128x128xbf16> to vector<128x128xbf16>
    %cst_74 = arith.constant dense<0.000000e+00> : vector<64x128xf32>
    %98 = tpu.matmul %95, %97, %cst_74 {dimension_numbers = #tpu.dot_dimension_numbers<[1], [0], [0], [1], [0, 0, 1, 1], [], []>} : vector<64x128xbf16>, vector<128x128xbf16>, vector<64x128xf32> -> vector<64x128xf32>
    %99 = arith.addf %93, %98 : vector<64x128xf32>
    %c1_75 = arith.constant 1 : index
    %c1_76 = arith.constant 1 : index
    %c0_77 = arith.constant 0 : index
    %100 = vector.load %arg9[%c1_75, %c1_76, %c0_77] : memref<10x10x128xbf16, #tpu.memory_space<vmem>>, vector<8x8x128xbf16>
    %101 = vector.shape_cast %100 : vector<8x8x128xbf16> to vector<64x128xbf16>
    %c4_78 = arith.constant 4 : index
    %c0_79 = arith.constant 0 : index
    %c0_80 = arith.constant 0 : index
    %102 = vector.load %arg4[%c4_78, %c0_79, %c0_80] : memref<9x128x128xbf16, #tpu.memory_space<vmem>>, vector<1x128x128xbf16>
    %103 = vector.shape_cast %102 : vector<1x128x128xbf16> to vector<128x128xbf16>
    %cst_81 = arith.constant dense<0.000000e+00> : vector<64x128xf32>
    %104 = tpu.matmul %101, %103, %cst_81 {dimension_numbers = #tpu.dot_dimension_numbers<[1], [0], [0], [1], [0, 0, 1, 1], [], []>} : vector<64x128xbf16>, vector<128x128xbf16>, vector<64x128xf32> -> vector<64x128xf32>
    %105 = arith.addf %99, %104 : vector<64x128xf32>
    %c1_82 = arith.constant 1 : index
    %c2_83 = arith.constant 2 : index
    %c0_84 = arith.constant 0 : index
    %106 = vector.load %arg9[%c1_82, %c2_83, %c0_84] : memref<10x10x128xbf16, #tpu.memory_space<vmem>>, vector<8x8x128xbf16>
    %107 = vector.shape_cast %106 : vector<8x8x128xbf16> to vector<64x128xbf16>
    %c5_85 = arith.constant 5 : index
    %c0_86 = arith.constant 0 : index
    %c0_87 = arith.constant 0 : index
    %108 = vector.load %arg4[%c5_85, %c0_86, %c0_87] : memref<9x128x128xbf16, #tpu.memory_space<vmem>>, vector<1x128x128xbf16>
    %109 = vector.shape_cast %108 : vector<1x128x128xbf16> to vector<128x128xbf16>
    %cst_88 = arith.constant dense<0.000000e+00> : vector<64x128xf32>
    %110 = tpu.matmul %107, %109, %cst_88 {dimension_numbers = #tpu.dot_dimension_numbers<[1], [0], [0], [1], [0, 0, 1, 1], [], []>} : vector<64x128xbf16>, vector<128x128xbf16>, vector<64x128xf32> -> vector<64x128xf32>
    %111 = arith.addf %105, %110 : vector<64x128xf32>
    %c2_89 = arith.constant 2 : index
    %c0_90 = arith.constant 0 : index
    %c0_91 = arith.constant 0 : index
    %112 = vector.load %arg9[%c2_89, %c0_90, %c0_91] : memref<10x10x128xbf16, #tpu.memory_space<vmem>>, vector<8x8x128xbf16>
    %113 = vector.shape_cast %112 : vector<8x8x128xbf16> to vector<64x128xbf16>
    %c6_92 = arith.constant 6 : index
    %c0_93 = arith.constant 0 : index
    %c0_94 = arith.constant 0 : index
    %114 = vector.load %arg4[%c6_92, %c0_93, %c0_94] : memref<9x128x128xbf16, #tpu.memory_space<vmem>>, vector<1x128x128xbf16>
    %115 = vector.shape_cast %114 : vector<1x128x128xbf16> to vector<128x128xbf16>
    %cst_95 = arith.constant dense<0.000000e+00> : vector<64x128xf32>
    %116 = tpu.matmul %113, %115, %cst_95 {dimension_numbers = #tpu.dot_dimension_numbers<[1], [0], [0], [1], [0, 0, 1, 1], [], []>} : vector<64x128xbf16>, vector<128x128xbf16>, vector<64x128xf32> -> vector<64x128xf32>
    %117 = arith.addf %111, %116 : vector<64x128xf32>
    %c2_96 = arith.constant 2 : index
    %c1_97 = arith.constant 1 : index
    %c0_98 = arith.constant 0 : index
    %118 = vector.load %arg9[%c2_96, %c1_97, %c0_98] : memref<10x10x128xbf16, #tpu.memory_space<vmem>>, vector<8x8x128xbf16>
    %119 = vector.shape_cast %118 : vector<8x8x128xbf16> to vector<64x128xbf16>
    %c7_99 = arith.constant 7 : index
    %c0_100 = arith.constant 0 : index
    %c0_101 = arith.constant 0 : index
    %120 = vector.load %arg4[%c7_99, %c0_100, %c0_101] : memref<9x128x128xbf16, #tpu.memory_space<vmem>>, vector<1x128x128xbf16>
    %121 = vector.shape_cast %120 : vector<1x128x128xbf16> to vector<128x128xbf16>
    %cst_102 = arith.constant dense<0.000000e+00> : vector<64x128xf32>
    %122 = tpu.matmul %119, %121, %cst_102 {dimension_numbers = #tpu.dot_dimension_numbers<[1], [0], [0], [1], [0, 0, 1, 1], [], []>} : vector<64x128xbf16>, vector<128x128xbf16>, vector<64x128xf32> -> vector<64x128xf32>
    %123 = arith.addf %117, %122 : vector<64x128xf32>
    %c2_103 = arith.constant 2 : index
    %c2_104 = arith.constant 2 : index
    %c0_105 = arith.constant 0 : index
    %124 = vector.load %arg9[%c2_103, %c2_104, %c0_105] : memref<10x10x128xbf16, #tpu.memory_space<vmem>>, vector<8x8x128xbf16>
    %125 = vector.shape_cast %124 : vector<8x8x128xbf16> to vector<64x128xbf16>
    %c8_106 = arith.constant 8 : index
    %c0_107 = arith.constant 0 : index
    %c0_108 = arith.constant 0 : index
    %126 = vector.load %arg4[%c8_106, %c0_107, %c0_108] : memref<9x128x128xbf16, #tpu.memory_space<vmem>>, vector<1x128x128xbf16>
    %127 = vector.shape_cast %126 : vector<1x128x128xbf16> to vector<128x128xbf16>
    %cst_109 = arith.constant dense<0.000000e+00> : vector<64x128xf32>
    %128 = tpu.matmul %125, %127, %cst_109 {dimension_numbers = #tpu.dot_dimension_numbers<[1], [0], [0], [1], [0, 0, 1, 1], [], []>} : vector<64x128xbf16>, vector<128x128xbf16>, vector<64x128xf32> -> vector<64x128xf32>
    %129 = arith.addf %123, %128 : vector<64x128xf32>
    %c0_110 = arith.constant 0 : index
    %c0_111 = arith.constant 0 : index
    %130 = vector.load %arg5[%c0_110, %c0_111] : memref<1x128xf32, #tpu.memory_space<vmem>>, vector<1x128xf32>
    %131 = vector.broadcast %130 : vector<1x128xf32> to vector<64x128xf32>
    %132 = arith.addf %129, %131 : vector<64x128xf32>
    %133 = arith.addf %132, %74 : vector<64x128xf32>
    %cst_112 = arith.constant 0.000000e+00 : f32
    %134 = vector.broadcast %cst_112 : f32 to vector<64x128xf32>
    %135 = arith.maximumf %133, %134 : vector<64x128xf32>
    %136 = vector.shape_cast %135 : vector<64x128xf32> to vector<1x8x8x128xf32>
    %c0_113 = arith.constant 0 : index
    %c0_114 = arith.constant 0 : index
    %c0_115 = arith.constant 0 : index
    %c0_116 = arith.constant 0 : index
    %137 = vector.load %arg8[%c0_113, %c0_114, %c0_115, %c0_116] : memref<1x8x8x128xf32, #tpu.memory_space<vmem>>, vector<1x8x8x128xf32>
    tpu.vector_store %arg8[%c0_113, %c0_114, %c0_115, %c0_116], %136 {strides = array<i32>} : memref<1x8x8x128xf32, #tpu.memory_space<vmem>>, vector<1x8x8x128xf32>,
    return
  }
  func.func @transform_0(%arg0: i32) -> (i32, i32, i32, i32) {
    %c0_i32 = arith.constant 0 : i32
    %c0_i32_0 = arith.constant 0 : i32
    %c0_i32_1 = arith.constant 0 : i32
    %c0_i32_2 = arith.constant 0 : i32
    return %arg0, %c0_i32, %c0_i32_0, %c0_i32_1 : i32, i32, i32, i32
  }
  func.func @transform_1(%arg0: i32) -> (i32, i32, i32) {
    %c0_i32 = arith.constant 0 : i32
    %c0_i32_0 = arith.constant 0 : i32
    %c0_i32_1 = arith.constant 0 : i32
    %c0_i32_2 = arith.constant 0 : i32
    return %c0_i32, %c0_i32_0, %c0_i32_1 : i32, i32, i32
  }
  func.func @transform_2(%arg0: i32) -> (i32, i32) {
    %c0_i32 = arith.constant 0 : i32
    %c0_i32_0 = arith.constant 0 : i32
    %c0_i32_1 = arith.constant 0 : i32
    return %c0_i32, %c0_i32_0 : i32, i32
  }
  func.func @transform_3(%arg0: i32) -> (i32, i32, i32) {
    %c0_i32 = arith.constant 0 : i32
    %c0_i32_0 = arith.constant 0 : i32
    %c0_i32_1 = arith.constant 0 : i32
    %c0_i32_2 = arith.constant 0 : i32
    return %c0_i32, %c0_i32_0, %c0_i32_1 : i32, i32, i32
  }
  func.func @transform_4(%arg0: i32) -> (i32, i32) {
    %c0_i32 = arith.constant 0 : i32
    %c0_i32_0 = arith.constant 0 : i32
    %c0_i32_1 = arith.constant 0 : i32
    return %c0_i32, %c0_i32_0 : i32, i32
  }
  func.func @transform_5(%arg0: i32) -> (i32, i32) {
    %c0_i32 = arith.constant 0 : i32
    %c0_i32_0 = arith.constant 0 : i32
    %c0_i32_1 = arith.constant 0 : i32
    return %c0_i32, %c0_i32_0 : i32, i32
  }
  func.func @transform_6(%arg0: i32) -> (i32, i32) {
    %c0_i32 = arith.constant 0 : i32
    %c0_i32_0 = arith.constant 0 : i32
    %c0_i32_1 = arith.constant 0 : i32
    return %c0_i32, %c0_i32_0 : i32, i32
  }
  func.func @transform_7(%arg0: i32) -> (i32, i32, i32, i32) {
    %c0_i32 = arith.constant 0 : i32
    %c0_i32_0 = arith.constant 0 : i32
    %c0_i32_1 = arith.constant 0 : i32
    %c0_i32_2 = arith.constant 0 : i32
    return %arg0, %c0_i32, %c0_i32_0, %c0_i32_1 : i32, i32, i32, i32
  }
}

</mosaic_0001>

<bundles_post_ra>
// kernel: resblock_forward.1
= control target key start
LH: loop header
LB: loop body
LE: loop exit
PB: predicated region body
PF: predicated region fallthrough
CT: control target
= control target key end

     0   :  { %s5196_s24 = smov 0   ;;  %s6337_s0 = inlined_call_operand.vmem [shape: f32[2,36,9,4], index: 0, kind: input, shape index: {}]   ;;  %s6338_s1 = inlined_call_operand.vmem [shape: bf16[9,4,128], index: 1, kind: input, shape index: {}]   ;;  %s6339_s2 = inlined_call_operand.vmem [shape: f32[1,128], index: 2, kind: input, shape index: {}]   ;;  %s6340_s3 = inlined_call_operand.vmem [shape: bf16[9,128,128], index: 3, kind: input, shape index: {}]   ;;  %s6341_s4 = inlined_call_operand.vmem [shape: f32[1,128], index: 4, kind: input, shape index: {}]   ;;  %s6342_s5 = inlined_call_operand.vmem [shape: bf16[4,128], index: 5, kind: input, shape index: {}]   ;;  %s6343_s6 = inlined_call_operand.vmem [shape: f32[1,128], index: 6, kind: input, shape index: {}]   ;;  %s6344_s7 = inlined_call_operand.vmem [shape: f32[2,8,8,128], index: 7, kind: output, shape index: {}]  }
   0x1 LB: > { %s3935_s25 = sadd.s32 4294967295, %s5153_s24   ;;  %p3939_p0 = scmp.ge.s32.totalorder %s5153_s24, 1  ;;  %s5153_s24 = sphi %s5196_s24, %s17_s24  }
   0x2   : > { %p237_p1 = scmp.lt.s32.totalorder %s5153_s24, 3 }
   0x4   : > { %p238_p2 = pnand %p3939_p0, %p237_p1 }
   0x6   : > { %241 = sbr.rel (%p238_p2) target bundleno = 810 (0x32a), region = 48 }
   0xd   : > { %v3943_v0 = vld [vmem:[%s6338_s1 + $0x2] sm:$0x3]  ;;  %vm418_vm0 = vcmask 1041408   ;;  %p269_p3 = scmp.lt.s32.totalorder %s3935_s25, 1  ;;  %v382_v2 = vld [vmem:[%s6338_s1] sm:$0x3] }
   0xe   : > { %5043 = vmatprep.subr.msk.bf16.mxu0 %vm418_vm0, %v3943_v0  ;;  %v420_v1 = vsel %vm418_vm0, %v3943_v0, 0  ;;  %v3976_v3 = vld [vmem:[%s6338_s1 + $0x4] sm:$0x3]  ;;  %v5227_v4 = vld [vmem:[%s6338_s1 + $0x6] sm:$0x3]  ;;  %vm405_vm1 = vcmask 31744  }
   0xf   : > { %4560 = vmatpush3.bf16.msra.mxu0 %v420_v1  ;;  %s6392_s25 = smov (!%p269_p3, %s3935_s25), 1  ;;  %v520_v15 = vsel %vm418_vm0, %v382_v2, 0  ;;  %v5280_v27 = vsel %vm418_vm0, %v3976_v3, 0  ;;  %v5290_v30 = vsel %vm418_vm0, %v5227_v4, 0  ;;  %vm611_vm2 = vsmask.f32 3328 }
  0x10   : > { %5044 = vmatprep.subr.msk.bf16.mxu0 %vm418_vm0, %v382_v2  ;;  %s5053_s30 = smul.u32 576, %s6392_s25  ;;  %vm612_vm3 = vsmask.f32 7440  ;;  %vm1746_vm5 = vcmask 1043456   ;;  %vm1747_vm6 = vsmask.f32 7938 }
  0x11   : > { %vm5337_vm4 = vmor %vm611_vm2, %vm612_vm3  ;;  %vm1752_vm7 = vcmask 1040384   ;;  %vm1753_vm8 = vsmask.f32 256  ;;  %vm2327_vm9 = vcmask 1042432   ;;  %vm2328_vm10 = vcmask 1046532   ;;  %s4334_s9 = sshll.u32 %s6392_s25, 6 }
  0x12   : > { %s5219_s10 = scalar_lea.vmem %s6337_s0, %s5053_s30  ;;  %vm5767_vm11 = vmand %vm1746_vm5, %vm1747_vm6  ;;  %s6324_s12 = scalar_lea.vmem %s6344_s7, %s4334_s9 }
  0x13   : > { %v298_v5 = vld [vmem:[%s5219_s10 + $0x90] sm:$0xff]  ;;  %v5231_v6 = vld [vmem:[%s5219_s10 + $0xa0] sm:$0xff]  ;;  %v281_v57 = vld [vmem:[%s5219_s10 + $0x8] sm:$0x1] }
  0x14   : > { %6354 = vst [vmem:[#allocation3_spill] sm:$0xff] %v5231_v6  ;;  %v5234_v7 = vld [vmem:[%s5219_s10 + $0xb0] sm:$0xff]  ;;  %v5237_v8 = vld [vmem:[%s5219_s10 + $0xc0] sm:$0xff]  ;;  %v4335_v10 = vpack.c.bf16 %v5231_v6, %v298_v5  ;;  %v283_v62 = vld [vmem:[%s5219_s10 + $0x18] sm:$0x1] }
  0x15   : > { %6355 = vst [vmem:[#allocation4_spill] sm:$0xff] %v5234_v7  ;;  %6356 = vst [vmem:[#allocation5_spill] sm:$0xff] %v5237_v8  ;;  %v5240_v9 = vld [vmem:[%s5219_s10 + $0xd0] sm:$0xff]  ;;  %v5246_v12 = vld [vmem:[%s5219_s10 + $0xe0] sm:$0xff]  ;;  %v4336_v13 = vpack.c.bf16 %v5237_v8, %v5234_v7 }
  0x16   : > { %6357 = vst [vmem:[#allocation6_spill] sm:$0xff] %v5240_v9  ;;  %6358 = vst [vmem:[#allocation7_spill] sm:$0xff] %v5246_v12  ;;  %v4337_v16 = vpack.c.bf16 %v5246_v12, %v5240_v9  ;;  %v5256_v17 = vld [vmem:[%s5219_s10 + $0xf0] sm:$0xff]  ;;  %v5259_v18 = vld [vmem:[%s5219_s10 + $0x100] sm:$0xff]  ;;  %4561 = vmatprep.mubr.msk.bf16.mxu0 %vm405_vm1, %v4335_v10 }
  0x17   : > { %6359 = vst [vmem:[#allocation8_spill] sm:$0xff] %v5256_v17  ;;  %v280_v19 = vld [vmem:[%s5219_s10] sm:$0xff]  ;;  %v5264_v20 = vld [vmem:[%s5219_s10 + $0x10] sm:$0xff]  ;;  %4562 = vmatmul.mubr.msk.bf16.vlgmr.msra.gmra.mrb[0].mxu0 %vm405_vm1, %v4336_v13  ;;  %v4338_v31 = vpack.c.bf16 %v5259_v18, %v5256_v17  ;;  %v319_v54 = vld [vmem:[%s5219_s10 + $0x138] sm:$0x1] }
  0x18   : > { %v4343_v21 = vpack.c.bf16 %v280_v19, %v280_v19  ;;  %v5267_v22 = vld [vmem:[%s5219_s10 + $0x20] sm:$0xff]  ;;  %v4345_v24 = vpack.c.bf16 %v5264_v20, %v5264_v20  ;;  %v5275_v25 = vld [vmem:[%s5219_s10 + $0x30] sm:$0xff]  ;;  %4570 = vmatpush3.bf16.msra.mxu0 %v520_v15  ;;  %4565 = vmatprep.mubr.msk.bf16.mxu0 %vm405_vm1, %v4337_v16  ;;  %v4339_v35 = vpack.c.bf16 %v5264_v20, %v280_v19  ;;  %v287_v16 = vld [vmem:[%s5219_s10 + $0x38] sm:$0x1] }
  0x19   : > { %6360 = vst [vmem:[#allocation9_spill] sm:$0xff] %v5275_v25  ;;  %v4347_v26 = vpack.c.bf16 %v5267_v22, %v5267_v22  ;;  %v5283_v28 = vld [vmem:[%s5219_s10 + $0x40] sm:$0xff]  ;;  %v5286_v29 = vld [vmem:[%s5219_s10 + $0x50] sm:$0xff]  ;;  %v4349_v34 = vpack.c.bf16 %v5275_v25, %v5275_v25  ;;  %5045 = vmatprep.subr.msk.bf16.mxu0 %vm418_vm0, %v3976_v3  ;;  %v4340_v39 = vpack.c.bf16 %v5275_v25, %v5267_v22  ;;  %v285_v3 = vld [vmem:[%s5219_s10 + $0x28] sm:$0x1] }
  0x1a   : > { %v615_v32 = vshrl.u32 %v4343_v21, 16  ;;  %v618_v33 = vshll.u32 %v4343_v21, 16  ;;  %v629_v36 = vshrl.u32 %v4345_v24, 16  ;;  %v632_v37 = vshll.u32 %v4345_v24, 16  ;;  %v5310_v51 = vld [vmem:[%s5219_s10 + $0x60] sm:$0xff]  ;;  %v5313_v52 = vld [vmem:[%s5219_s10 + $0x70] sm:$0xff]  ;;  %vm5774_vm12 = vmand %vm1752_vm7, %vm1753_vm8 }
  0x1b   : > { %v643_v38 = vshrl.u32 %v4347_v26, 16  ;;  %v646_v40 = vshll.u32 %v4347_v26, 16  ;;  %v657_v41 = vshrl.u32 %v4349_v34, 16  ;;  %v4341_v42 = vpack.c.bf16 %v5286_v29, %v5283_v28  ;;  %v327_v17 = vld [vmem:[%s5219_s10 + $0x178] sm:$0x1]  ;;  %vm5799_vm13 = vmor %vm2327_vm9, %vm2328_vm10 }
  0x1c   : > { %v617_v43 = vrot.slane %v615_v32, 4  ;;  %v620_v44 = vrot.slane %v618_v33, 5  ;;  %v631_v45 = vrot.slane %v629_v36, 4  ;;  %v660_v46 = vshll.u32 %v4349_v34, 16 }
  0x1d   : > { %v634_v47 = vrot.slane %v632_v37, 5  ;;  %v5303_v48 = vrot.slane %v643_v38, 4  ;;  %v4351_v49 = vpack.c.bf16 %v5283_v28, %v5283_v28  ;;  %v4353_v50 = vpack.c.bf16 %v5286_v29, %v5286_v29 }
  0x1e   : > { %v659_v53 = vrot.slane %v657_v41, 4  ;;  %v4355_v55 = vpack.c.bf16 %v5310_v51, %v5310_v51  ;;  %v4357_v56 = vpack.c.bf16 %v5313_v52, %v5313_v52  ;;  %v662_v63 = vrot.slane %v660_v46, 5  ;;  %v291_v41 = vld [vmem:[%s5219_s10 + $0x58] sm:$0x1] }
  0x1f   : > { %v671_v58 = vshrl.u32 %v4351_v49, 16  ;;  %v674_v59 = vshll.u32 %v4351_v49, 16  ;;  %v685_v60 = vshrl.u32 %v4353_v50, 16  ;;  %v688_v61 = vshll.u32 %v4353_v50, 16  ;;  %4566 = vmatmul.mubr.msk.bf16.gmra.mrb[4].mxu0 %vm405_vm1, %v4338_v31 }
  0x20   : > { %v699_v0 = vshrl.u32 %v4355_v55, 16  ;;  %v702_v1 = vshll.u32 %v4355_v55, 16  ;;  %v713_v2 = vshrl.u32 %v4357_v56, 16  ;;  %4571 = vmatprep.mubr.msk.bf16.mxu0 %vm405_vm1, %v4339_v35  ;;  %v648_v5 = vrot.slane %v646_v40, 5  ;;  %v289_v40 = vld [vmem:[%s5219_s10 + $0x48] sm:$0x1] }
  0x21   : > { %v673_v10 = vrot.slane %v671_v58, 4  ;;  %v676_v13 = vrot.slane %v674_v59, 5  ;;  %v716_v15 = vshll.u32 %v4357_v56, 16  ;;  %v687_v19 = vrot.slane %v685_v60, 4  ;;  %v5345_v60 = vld [vmem:[%s6338_s1 + $0x8] sm:$0x3] }
  0x22   : > { %v690_v21 = vrot.slane %v688_v61, 5  ;;  %v5327_v24 = vrot.slane %v699_v0, 4  ;;  %v5329_v26 = vrot.slane %v702_v1, 5  ;;  %v4344_v31 = vpack.c.bf16 %v281_v57, %v281_v57 }
  0x23   : > { %v4346_v32 = vpack.c.bf16 %v283_v62, %v283_v62  ;;  %v621_v33 = vor.u32 %v620_v44, %v617_v43  ;;  %v635_v34 = vor.u32 %v634_v47, %v631_v45  ;;  %v5331_v36 = vrot.slane %v713_v2, 4 }
  0x24   : > { %v4348_v35 = vpack.c.bf16 %v285_v3, %v285_v3  ;;  %v4350_v37 = vpack.c.bf16 %v287_v16, %v287_v16  ;;  %v663_v38 = vor.u32 %v662_v63, %v659_v53  ;;  %v624_v49 = vshll.u32 %v4344_v31, 16  ;;  %v293_v3 = vld [vmem:[%s5219_s10 + $0x68] sm:$0x1] }
  0x25   : > { %v622_v46 = vrot.slane %v621_v33, 4  ;;  %v636_v50 = vrot.slane %v635_v34, 4  ;;  %v638_v55 = vshll.u32 %v4346_v32, 16  ;;  %v718_v56 = vrot.slane %v716_v15, 5  ;;  %v5378_v32 = vld [vmem:[%s6338_s1 + $0xa] sm:$0x3] }
  0x26   : > { %v649_v43 = vor.u32 %v648_v5, %v5303_v48  ;;  %v652_v44 = vshll.u32 %v4348_v35, 16  ;;  %v666_v45 = vshll.u32 %v4350_v37, 16  ;;  %v626_v47 = vrot.slane %v624_v49, 5  ;;  %v295_v5 = vld [vmem:[%s5219_s10 + $0x78] sm:$0x1] }
  0x27   : > { %v640_v53 = vrot.slane %v638_v55, 5  ;;  %v4352_v57 = vpack.c.bf16 %v289_v40, %v289_v40  ;;  %v4354_v59 = vpack.c.bf16 %v291_v41, %v291_v41  ;;  %4572 = vmatmul.mubr.msk.bf16.vlgmr.msra.gmra.mrb[0].mxu0 %vm405_vm1, %v4340_v39  ;;  %v664_v61 = vrot.slane %v663_v38, 4  ;;  %v5404_v55 = vld [vmem:[%s5219_s10 + $0x130] sm:$0xff] }
  0x28   : > { %v668_v48 = vrot.slane %v666_v45, 5  ;;  %v677_v62 = vor.u32 %v676_v13, %v673_v10  ;;  %v691_v63 = vor.u32 %v690_v21, %v687_v19  ;;  %4580 = vmatpush3.bf16.msra.mxu0 %v5280_v27  ;;  %4575 = vmatprep.mubr.msk.bf16.mxu0 %vm405_vm1, %v4341_v42  ;;  %v627_v0 = vsel %vm5337_vm4, %v622_v46, %v626_v47  ;;  %v5369_v42 = vld [vmem:[%s5219_s10 + $0x120] sm:$0xff] }
  0x29   : > { %v5360_v1 = vsel %vm5337_vm4, %v636_v50, %v640_v53  ;;  %v680_v39 = vshll.u32 %v4352_v57, 16  ;;  %v694_v2 = vshll.u32 %v4354_v59, 16  ;;  %v4342_v10 = vpack.c.bf16 %v5313_v52, %v5310_v51  ;;  %5046 = vmatprep.subr.msk.bf16.mxu0 %vm418_vm0, %v5227_v4  ;;  %v5383_v4 = vld [vmem:[%s6342_s5] sm:$0x3] }
  0x2a   : > { %v650_v27 = vrot.slane %v649_v43, 4  ;;  %v678_v13 = vrot.slane %v677_v62, 4  ;;  %v5373_v15 = vsel %vm418_vm0, %v5345_v60, 0  ;;  %v654_v16 = vrot.slane %v652_v44, 5  ;;  %5052 = vmatprep.subr.msk.bf16.mxu1 %vm418_vm0, %v5383_v4  ;;  %v5409_v45 = vld [vmem:[%s5219_s10 + $0x140] sm:$0xff] }
  0x2b   : > { %v682_v19 = vrot.slane %v680_v39, 5  ;;  %v692_v21 = vrot.slane %v691_v63, 4  ;;  %v696_v31 = vrot.slane %v694_v2, 5  ;;  %v3977_v33 = vcombine.low %v627_v0, %v5360_v1  ;;  %v5438_v39 = vld [vmem:[%s5219_s10 + $0x160] sm:$0xff]  ;;  %v5441_v2 = vld [vmem:[%s5219_s10 + $0x170] sm:$0xff] }
  0x2c   : > { %v5388_v34 = vsel %vm5337_vm4, %v664_v61, %v668_v48  ;;  %v4356_v35 = vpack.c.bf16 %v293_v3, %v293_v3  ;;  %v4358_v37 = vpack.c.bf16 %v295_v5, %v295_v5  ;;  %v705_v40 = vor.u32 %v5329_v26, %v5327_v24  ;;  %v5414_v24 = vld [vmem:[%s6338_s1 + $0xc] sm:$0x3]  ;;  %v5433_v48 = vld [vmem:[%s5219_s10 + $0x150] sm:$0xff] }
  0x2d   : > { %6363 = vst [vmem:[#allocation10_spill] sm:$0xff] %v5388_v34  ;;  %v5394_v38 = vsel %vm5337_vm4, %v678_v13, %v682_v19  ;;  %v719_v41 = vor.u32 %v718_v56, %v5331_v36  ;;  %v4367_v46 = vpack.c.bf16 %v5369_v42, %v5369_v42  ;;  %v4369_v44 = vpack.c.bf16 %v5404_v55, %v5404_v55  ;;  %v5444_v13 = vld [vmem:[%s5219_s10 + $0x180] sm:$0xff] }
  0x2e   : > { %6364 = vst [vmem:[#allocation11_spill] sm:$0xff] %v5394_v38  ;;  %v708_v50 = vshll.u32 %v4356_v35, 16  ;;  %v722_v43 = vshll.u32 %v4358_v37, 16  ;;  %v5419_v26 = vsel %vm5337_vm4, %v650_v27, %v654_v16  ;;  %v4371_v56 = vpack.c.bf16 %v5409_v45, %v5409_v45 }
  0x2f   : > { %4576 = vmatmul.mubr.msk.bf16.gmra.mrb[4].mxu0 %vm405_vm1, %v4342_v10  ;;  %v1073_v36 = vshrl.u32 %v4367_v46, 16  ;;  %v5425_v47 = vsel %vm418_vm0, %v5378_v32, 0  ;;  %v5430_v53 = vsel %vm5337_vm4, %v692_v21, %v696_v31  ;;  %v706_v57 = vrot.slane %v705_v40, 4  ;;  %v332_v31 = vld [vmem:[%s5219_s10 + $0x1b0] sm:$0xff] }
  0x30   : > { %4581 = vmatprep.mubr.msk.bf16.mxu0 %vm405_vm1, %v3977_v33  ;;  %v710_v59 = vrot.slane %v708_v50, 5  ;;  %v720_v61 = vrot.slane %v719_v41, 4  ;;  %v724_v62 = vrot.slane %v722_v43, 5  ;;  %v1076_v63 = vshll.u32 %v4367_v46, 16  ;;  %v334_v33 = vld [vmem:[%s5219_s10 + $0x1c0] sm:$0xff] }
  0x31   : > { %v4373_v0 = vpack.c.bf16 %v5433_v48, %v5433_v48  ;;  %v1087_v3 = vshrl.u32 %v4369_v44, 16  ;;  %v1090_v5 = vshll.u32 %v4369_v44, 16  ;;  %v1101_v10 = vshrl.u32 %v4371_v56, 16 }
  0x32   : > { %v1104_v27 = vshll.u32 %v4371_v56, 16  ;;  %v3978_v16 = vcombine.low %v5419_v26, %v5388_v34  ;;  %v3979_v19 = vcombine.low %v5394_v38, %v5430_v53  ;;  %v5450_v21 = vrot.slane %v1073_v36, 4  ;;  %v5471_v36 = vld [vmem:[%s5219_s10 + $0x190] sm:$0xff]  ;;  %v323_v38 = vld [vmem:[%s5219_s10 + $0x158] sm:$0x1] }
  0x33   : > { %v5456_v35 = vsel %vm418_vm0, %v5414_v24, 0  ;;  %v1115_v37 = vshrl.u32 %v4373_v0, 16  ;;  %v1118_v40 = vshll.u32 %v4373_v0, 16  ;;  %v4375_v41 = vpack.c.bf16 %v5438_v39, %v5438_v39  ;;  %v317_v0 = vld [vmem:[%s5219_s10 + $0x128] sm:$0x1] }
  0x34   : > { %v4377_v46 = vpack.c.bf16 %v5441_v2, %v5441_v2  ;;  %v5464_v50 = vsel %vm5337_vm4, %v706_v57, %v710_v59  ;;  %v5468_v43 = vsel %vm5337_vm4, %v720_v61, %v724_v62  ;;  %v1078_v44 = vrot.slane %v1076_v63, 5  ;;  %v321_v63 = vld [vmem:[%s5219_s10 + $0x148] sm:$0x1] }
  0x35   : > { %v4379_v56 = vpack.c.bf16 %v5444_v13, %v5444_v13  ;;  %v1089_v49 = vrot.slane %v1087_v3, 4  ;;  %v1092_v23 = vrot.slane %v1090_v5, 5  ;;  %v1103_v14 = vrot.slane %v1101_v10, 4 }
  0x36   : > { %v1106_v11 = vrot.slane %v1104_v27, 5  ;;  %v1129_v57 = vshrl.u32 %v4375_v41, 16  ;;  %v1132_v59 = vshll.u32 %v4375_v41, 16  ;;  %v4381_v61 = vpack.c.bf16 %v5471_v36, %v5471_v36 }
  0x37   : > { %4582 = vmatmul.mubr.msk.bf16.vlgmr.msra.gmra.mrb[0].mxu0 %vm405_vm1, %v3978_v16  ;;  %v5480_v62 = vpack.c.bf16 %v334_v33, %v332_v31  ;;  %v1117_v3 = vrot.slane %v1115_v37, 4  ;;  %v1120_v5 = vrot.slane %v1118_v40, 5  ;;  %v1143_v10 = vshrl.u32 %v4377_v46, 16 }
  0x38   : > { %4590 = vmatpush3.bf16.msra.mxu0 %v5290_v30  ;;  %4585 = vmatprep.mubr.msk.bf16.mxu0 %vm405_vm1, %v3979_v19  ;;  %v1146_v27 = vshll.u32 %v4377_v46, 16  ;;  %v1157_v16 = vshrl.u32 %v4379_v56, 16  ;;  %v1160_v41 = vshll.u32 %v4379_v56, 16  ;;  %v1171_v34 = vshrl.u32 %v4381_v61, 16  ;;  %v325_v19 = vld [vmem:[%s5219_s10 + $0x168] sm:$0x1] }
  0x39   : > { %5047 = vmatprep.subr.msk.bf16.mxu0 %vm418_vm0, %v5345_v60  ;;  %v1174_v31 = vshll.u32 %v4381_v61, 16  ;;  %4651 = vmatprep.mubr.msk.bf16.mxu1 %vm405_vm1, %v5480_v62  ;;  %v4359_v30 = vpack.c.bf16 %v5404_v55, %v5369_v42  ;;  %v4368_v33 = vpack.c.bf16 %v317_v0, %v317_v0  ;;  %v3980_v37 = vcombine.low %v5464_v50, %v5468_v43 }
  0x3a   : > { %v1131_v40 = vrot.slane %v1129_v57, 4  ;;  %v1134_v46 = vrot.slane %v1132_v59, 5  ;;  %v4370_v12 = vpack.c.bf16 %v319_v54, %v319_v54  ;;  %v1145_v60 = vrot.slane %v1143_v10, 4 }
  0x3b   : > { %v1148_v56 = vrot.slane %v1146_v27, 5  ;;  %v4372_v8 = vpack.c.bf16 %v321_v63, %v321_v63  ;;  %v4374_v61 = vpack.c.bf16 %v323_v38, %v323_v38  ;;  %v1159_v9 = vrot.slane %v1157_v16, 4  ;;  %v329_v38 = vld [vmem:[%s5219_s10 + $0x188] sm:$0x1]  ;;  %v5523_v27 = vld [vmem:[%s5219_s10 + $0x80] sm:$0xff] }
  0x3c   : > { %v1079_v6 = vor.u32 %v1078_v44, %v5450_v21  ;;  %v5497_v7 = vshll.u32 %v4368_v33, 16  ;;  %v1162_v42 = vrot.slane %v1160_v41, 5  ;;  %v5499_v55 = vrot.slane %v1171_v34, 4 }
  0x3d   : > { %v1176_v0 = vrot.slane %v1174_v31, 5  ;;  %v1093_v25 = vor.u32 %v1092_v23, %v1089_v49  ;;  %v5502_v54 = vshll.u32 %v4370_v12, 16  ;;  %v1107_v57 = vor.u32 %v1106_v11, %v1103_v14  ;;  %v331_v14 = vld [vmem:[%s5219_s10 + $0x198] sm:$0x1]  ;;  %v297_v31 = vld [vmem:[%s5219_s10 + $0x88] sm:$0x1] }
  0x3e   : > { %v1121_v59 = vor.u32 %v1120_v5, %v1117_v3  ;;  %v4376_v63 = vpack.c.bf16 %v325_v19, %v325_v19  ;;  %v5506_v21 = vshll.u32 %v4372_v8, 16  ;;  %v5508_v44 = vshll.u32 %v4374_v61, 16 }
  0x3f   : > { %4586 = vmatmul.mubr.msk.bf16.gmra.mrb[4].mxu0 %vm405_vm1, %v3980_v37  ;;  %v4378_v34 = vpack.c.bf16 %v327_v17, %v327_v17  ;;  %v4360_v23 = vpack.c.bf16 %v5433_v48, %v5409_v45  ;;  %v4361_v12 = vpack.c.bf16 %v5441_v2, %v5438_v39  ;;  %v5514_v49 = vrot.slane %v1079_v6, 4  ;;  %v5533_v39 = vld [vmem:[%s5219_s10 + $0x110] sm:$0xff] }
  0x40   : > { %4591 = vmatprep.mubr.msk.bf16.mxu0 %vm405_vm1, %v4359_v30  ;;  %v1084_v11 = vrot.slane %v5497_v7, 5  ;;  %v5518_v3 = vrot.slane %v1093_v25, 4  ;;  %v1135_v8 = vor.u32 %v1134_v46, %v1131_v40  ;;  %v5520_v5 = vshll.u32 %v4376_v63, 16 }
  0x41   : > { %v1149_v10 = vor.u32 %v1148_v56, %v1145_v60  ;;  %v1098_v17 = vrot.slane %v5502_v54, 5  ;;  %v5526_v45 = vrot.slane %v1107_v57, 4  ;;  %v5528_v48 = vrot.slane %v1121_v59, 4  ;;  %v336_v60 = vld [vmem:[%s5219_s10 + $0x1d0] sm:$0xff]  ;;  %v5063_v59 = vld [vmem:[%s6340_s3 + $0x80] sm:$0xff]  }
  0x42   : > { %v5530_v6 = vshll.u32 %v4378_v34, 16  ;;  %v1112_v25 = vrot.slane %v5506_v21, 5  ;;  %v1126_v2 = vrot.slane %v5508_v44, 5  ;;  %v4380_v16 = vpack.c.bf16 %v329_v38, %v329_v38  ;;  %v4037_v44 = vld [vmem:[%s6338_s1 + $0xe] sm:$0x3] }
  0x43   : > { %v1163_v41 = vor.u32 %v1162_v42, %v1159_v9  ;;  %v5542_v19 = vrot.slane %v1135_v8, 4  ;;  %v1140_v37 = vrot.slane %v5520_v5, 5  ;;  %v5545_v40 = vrot.slane %v1149_v10, 4  ;;  %v338_v9 = vld [vmem:[%s5219_s10 + $0x1e0] sm:$0xff] }
  0x44   : > { %v4382_v46 = vpack.c.bf16 %v331_v14, %v331_v14  ;;  %v1154_v56 = vrot.slane %v5530_v6, 5  ;;  %v1177_v61 = vor.u32 %v1176_v0, %v5499_v55  ;;  %v4391_v57 = vpack.c.bf16 %v5523_v27, %v5523_v27  ;;  %v340_v0 = vld [vmem:[%s5219_s10 + $0x1f0] sm:$0xff] }
  0x45   : > { %v1164_v63 = vrot.slane %v1163_v41, 4  ;;  %v1166_v38 = vshll.u32 %v4380_v16, 16  ;;  %v4392_v10 = vpack.c.bf16 %v297_v31, %v297_v31  ;;  %v1809_v16 = vsel %vm418_vm0, %v5383_v4, 0 }
  0x46   : > { %v1482_v14 = vshrl.u32 %v4391_v57, 16  ;;  %v1485_v8 = vshll.u32 %v4391_v57, 16  ;;  %v1180_v6 = vshll.u32 %v4382_v46, 16  ;;  %v1178_v41 = vrot.slane %v1177_v61, 4  ;;  %4650 = vmatpush3.bf16.msra.mxu1 %v1809_v16  ;;  %v5079_v16 = vld [vmem:[%s6340_s3 + $0x78] sm:$0xff]  }
  0x47   : > { %4592 = vmatmul.mubr.msk.bf16.vlgmr.msra.gmra.mrb[0].mxu0 %vm405_vm1, %v4360_v23  ;;  %v342_v23 = vld [vmem:[%s5219_s10 + $0x200] sm:$0xff]  ;;  %v1491_v34 = vshll.u32 %v4392_v10, 16  ;;  %v4364_v42 = vpack.c.bf16 %v338_v9, %v336_v60  ;;  %4707 = vmatprep.subr.bf16.mxu1 %v5063_v59  ;;  %v1168_v57 = vrot.slane %v1166_v38, 5  ;;  %v1113_v7 = vsel %vm5337_vm4, %v5526_v45, %v1112_v25  ;;  %v4048_v45 = vld [vmem:[%s6338_s1 + $0x10] sm:$0x3]  ;;  %v5076_v10 = vld [vmem:[%s6340_s3 + $0xb8] sm:$0xff]  }
  0x48   : > { %4600 = vmatpush3.bf16.msra.mxu0 %v5373_v15  ;;  %4595 = vmatprep.mubr.msk.bf16.mxu0 %vm405_vm1, %v4361_v12  ;;  %v4362_v12 = vpack.c.bf16 %v5471_v36, %v5444_v13  ;;  %v1484_v55 = vrot.slane %v1482_v14, 4  ;;  %v4365_v31 = vpack.c.bf16 %v342_v23, %v340_v0  ;;  %v344_v13 = vld [vmem:[%s5219_s10 + $0x210] sm:$0xff]  ;;  %v346_v36 = vld [vmem:[%s5219_s10 + $0x220] sm:$0xff]  ;;  %v1182_v46 = vrot.slane %v1180_v6, 5  ;;  %v5071_v0 = vld [vmem:[%s6340_s3 + $0x58] sm:$0xff]  }
  0x49   : > { %5048 = vmatprep.subr.msk.bf16.mxu0 %vm418_vm0, %v5378_v32  ;;  %v1487_v32 = vrot.slane %v1485_v8, 5  ;;  %v1493_v15 = vrot.slane %v1491_v34, 5  ;;  %4652 = vmatmul.mubr.msk.bf16.vlgmr.msra.gmra.mrb[0].mxu1 %vm405_vm1, %v4364_v42  ;;  %v4366_v9 = vpack.c.bf16 %v346_v36, %v344_v13  ;;  %v1155_v54 = vsel %vm5337_vm4, %v5545_v40, %v1154_v56  ;;  %v6374_v40 = vld [vmem:[#allocation5_spill] sm:$0xff]  ;;  %v5069_v34 = vld [vmem:[%s6340_s3 + $0x50] sm:$0xff]   ;;  %v5072_v23 = vld [vmem:[%s6340_s3 + $0xa8] sm:$0xff]  }
  0x4a   : > { %4708 = vmatpush3.bf16.msra.mxu1 %v5063_v59  ;;  %4655 = vmatprep.mubr.msk.bf16.mxu1 %vm405_vm1, %v4365_v31  ;;  %v6382_v59 = vld [vmem:[#allocation11_spill] sm:$0xff]  ;;  %v6384_v38 = vcombine.low %v5430_v53, %v5464_v50  ;;  %v5155_v53 = vmov 0   ;;  %v5067_v50 = vld [vmem:[%s6340_s3 + $0x48] sm:$0xff]   ;;  %v5073_v14 = vld [vmem:[%s6340_s3 + $0x60] sm:$0xff]  }
  0x4b   : > { %v1488_v33 = vor.u32 %v1487_v32, %v1484_v55  ;;  %1619 = vst [vmem:[#allocation2 + $0x18] sm:$0xf] %v5155_v53  ;;  %1620 = vst [vmem:[#allocation2 + $0x1c] sm:$0x1] %v5155_v53  ;;  %v5070_v55 = vld [vmem:[%s6340_s3 + $0xa0] sm:$0xff]   ;;  %v5074_v8 = vld [vmem:[%s6340_s3 + $0xb0] sm:$0xff]  }
  0x4c   : > { %1613 = vst [vmem:[#allocation2] sm:$0xf] %v5155_v53  ;;  %1614 = vst [vmem:[#allocation2 + $0x4] sm:$0x1] %v5155_v53  ;;  %v5729_v6 = vld [vmem:[%s6340_s3 + $0xc0] sm:$0xff]  }
  0x4d   : > { %v1489_v30 = vrot.slane %v1488_v33, 4  ;;  %v6371_v33 = vld [vmem:[#allocation3_spill] sm:$0xff]  ;;  %1615 = vst [vmem:[#allocation2 + $0x8] sm:$0xf] %v5155_v53  ;;  %1616 = vst [vmem:[#allocation2 + $0xc] sm:$0x1] %v5155_v53 }
  0x4e   : > { %1617 = vst [vmem:[#allocation2 + $0x10] sm:$0xf] %v5155_v53  ;;  %1618 = vst [vmem:[#allocation2 + $0x14] sm:$0x1] %v5155_v53  ;;  %v5748_v13 = vld [vmem:[%s6339_s2] ss:$0 sm:$0xff] }
  0x4f   : > { %4596 = vmatmul.mubr.msk.bf16.gmra.mrb[4].mxu0 %vm405_vm1, %v4362_v12  ;;  %v1494_v4 = vsel %vm5337_vm4, %v1489_v30, %v1493_v15  ;;  %1621 = vst [vmem:[#allocation2 + $0x20] sm:$0xf] %v5155_v53  ;;  %1622 = vst [vmem:[#allocation2 + $0x24] sm:$0x1] %v5155_v53  ;;  %v5075_v15 = vld [vmem:[%s6340_s3 + $0x68] sm:$0xff]   ;;  %v5077_v12 = vld [vmem:[%s6340_s3 + $0x70] sm:$0xff]  }
  0x50   : > { %4601 = vmatprep.mubr.msk.bf16.mxu0 %vm405_vm1, %v5480_v62  ;;  %v4052_v60 = vcombine.low %v5468_v43, %v1494_v4  ;;  %v1085_v62 = vsel %vm5337_vm4, %v5514_v49, %v1084_v11  ;;  %v1099_v43 = vsel %vm5337_vm4, %v5518_v3, %v1098_v17  ;;  %v1169_v11 = vsel %vm5337_vm4, %v1164_v63, %v1168_v57 }
  0x51   : > { %4656 = vmatmul.mubr.msk.bf16.gmra.mrb[4].mxu1 %vm405_vm1, %v4366_v9  ;;  %v4020_v30 = vcombine.low %v1085_v62, %v1099_v43  ;;  %v1183_v3 = vsel %vm5337_vm4, %v1178_v41, %v1182_v46  ;;  %v6365_v17 = vpack.c.bf16 %v5267_v22, %v5264_v20  ;;  %v6369_v20 = vpack.c.bf16 %v5523_v27, %v5313_v52  ;;  %v6370_v22 = vld [vmem:[#allocation4_spill] sm:$0xff]  ;;  %v5738_v41 = vld [vmem:[%s6340_s3] sm:$0xff]  }
  0x52   : > { %v4023_v5 = vcombine.low %v1169_v11, %v1183_v3  ;;  %v6379_v52 = vpack.c.bf16 %v5533_v39, %v5259_v18  ;;  %v6380_v27 = vcombine.low %v5360_v1, %v5419_v26  ;;  %v5064_v18 = vld [vmem:[%s6340_s3 + $0x88] sm:$0xff]   ;;  %v5065_v1 = vld [vmem:[%s6340_s3 + $0x40] sm:$0xff]   ;;  %v5066_v26 = vld [vmem:[%s6340_s3 + $0x90] sm:$0xff]   ;;  %1623 = vst [vmem:[#allocation2 + $0x28] sm:$0xf] %v5155_v53 }
  0x53   : > { %4709 = vmatprep.subr.bf16.mxu1 %v5064_v18  ;;  %1624 = vst [vmem:[#allocation2 + $0x2c] sm:$0x1] %v5155_v53  ;;  %1625 = vst [vmem:[#allocation2 + $0x30] sm:$0xf] %v5155_v53  ;;  %v5068_v39 = vld [vmem:[%s6340_s3 + $0x98] sm:$0xff]  }
  0x54   : > { %4710 = vmatpush3.bf16.msra.mxu1 %v5064_v18  ;;  %1626 = vst [vmem:[#allocation2 + $0x34] sm:$0x1] %v5155_v53  ;;  %1627 = vst [vmem:[#allocation2 + $0x38] sm:$0xf] %v5155_v53  ;;  %v5741_v32 = vld [vmem:[#allocation2] sm:$0xf] }
  0x55   : > { %1628 = vst [vmem:[#allocation2 + $0x3c] sm:$0x1] %v5155_v53  ;;  %1629 = vst [vmem:[#allocation2 + $0x40] sm:$0xf] %v5155_v53  ;;  %4711 = vmatprep.subr.bf16.mxu1 %v5066_v26  ;;  %v1909_v57 = vshrl.u32 %v5741_v32, 16 }
  0x56   : > { %1630 = vst [vmem:[#allocation2 + $0x44] sm:$0x1] %v5155_v53  ;;  %1631 = vst [vmem:[#allocation2 + $0x48] sm:$0xf] %v5155_v53 }
  0x57   : > { %4602 = vmatmul.mubr.msk.bf16.vlgmr.msra.gmra.mrb[0].mxu0 %vm405_vm1, %v4364_v42  ;;  %v6381_v42 = vld [vmem:[#allocation10_spill] sm:$0xff]  ;;  %1632 = vst [vmem:[#allocation2 + $0x4c] sm:$0x1] %v5155_v53  ;;  %v1911_v36 = vrot.slane %v1909_v57, 4 }
  0x58   : > { %4610 = vmatpush3.bf16.msra.mxu0 %v5425_v47  ;;  %4605 = vmatprep.mubr.msk.bf16.mxu0 %vm405_vm1, %v4365_v31  ;;  %v1127_v47 = vsel %vm5337_vm4, %v5528_v48, %v1126_v2  ;;  %v6366_v48 = vld [vmem:[#allocation9_spill] sm:$0xff]  ;;  %v6368_v2 = vpack.c.bf16 %v5310_v51, %v5286_v29  ;;  %v6376_v29 = vld [vmem:[#allocation8_spill] sm:$0xff]  ;;  %v6377_v51 = vld [vmem:[#allocation7_spill] sm:$0xff]  ;;  %v6383_v63 = vcombine.low %v6381_v42, %v6382_v59  ;;  %v1912_v31 = vshll.u32 %v5741_v32, 16 }
  0x59   : > { %5049 = vmatprep.subr.msk.bf16.mxu0 %vm418_vm0, %v5414_v24  ;;  %v1141_v24 = vsel %vm5337_vm4, %v5542_v19, %v1140_v37  ;;  %v4021_v21 = vcombine.low %v1113_v7, %v1127_v47  ;;  %v6367_v25 = vpack.c.bf16 %v5283_v28, %v6366_v48  ;;  %v6372_v19 = vpack.c.bf16 %v6370_v22, %v6371_v33  ;;  %v6373_v37 = vld [vmem:[#allocation6_spill] sm:$0xff] }
  0x5a   : > { %v4022_v49 = vcombine.low %v1141_v24, %v1155_v54  ;;  %v1515_v28 = vsel %vm418_vm0, %v4048_v45, 0  ;;  %v6375_v56 = vpack.c.bf16 %v6373_v37, %v6374_v40  ;;  %v6378_v61 = vpack.c.bf16 %v6376_v29, %v6377_v51  ;;  %4712 = vmatpush3.bf16.msra.mxu1 %v5066_v26  ;;  %v5755_v54 = vld [vmem:[#allocation2] sm:$0xe] }
  0x5b   : > { %4713 = vmatprep.subr.bf16.mxu1 %v5068_v39  ;;  %v1914_v46 = vrot.slane %v1912_v31, 5 }
  0x5e   : > { %4714 = vmatpush3.bf16.msra.mxu1 %v5068_v39 }
  0x5f   : > { %4606 = vmatmul.mubr.msk.bf16.gmra.mrb[4].mxu0 %vm405_vm1, %v4366_v9  ;;  %4715 = vmatprep.subr.bf16.mxu1 %v5070_v55 }
  0x60   : > { %4611 = vmatprep.mubr.msk.bf16.mxu0 %vm405_vm1, %v4020_v30  ;;  %v5752_v30 = vld [vmem:[#allocation2 + $0x4] sm:$0x1] }
  0x61   : > { %v2332_v48 = vrot.slane %v5752_v30, 5 }
  0x62   : > { %4716 = vmatpush3.bf16.msra.mxu1 %v5070_v55 }
  0x63   : > { %4717 = vmatprep.subr.bf16.mxu1 %v5072_v23 }
  0x66   : > { %4718 = vmatpush3.bf16.msra.mxu1 %v5072_v23  ;;  %v1770_v23 = vld [vmem:[#allocation2 + $0x20] sm:$0xf] }
  0x67   : > { %4612 = vmatmul.mubr.msk.bf16.vlgmr.msra.gmra.mrb[0].mxu0 %vm405_vm1, %v4021_v21  ;;  %4719 = vmatprep.subr.bf16.mxu1 %v5074_v8  ;;  %v1915_v21 = vor.u32 %v1914_v46, %v1911_v36 }
  0x68   : > { %4620 = vmatpush3.bf16.msra.mxu0 %v5456_v35  ;;  %4615 = vmatprep.mubr.msk.bf16.mxu0 %vm405_vm1, %v4022_v49  ;;  %v1403_v35 = vsel %vm418_vm0, %v4037_v44, 0  ;;  %v1918_v49 = vshll.u32 %v5752_v30, 16 }
  0x69   : > { %5050 = vmatprep.subr.msk.bf16.mxu0 %vm418_vm0, %v4037_v44 }
  0x6a   : > { %4720 = vmatpush3.bf16.msra.mxu1 %v5074_v8  ;;  %v5763_v22 = vrot.slane %v1918_v49, 5 }
  0x6b   : > { %4721 = vmatprep.subr.bf16.mxu1 %v5076_v10 }
  0x6e   : > { %4722 = vmatpush3.bf16.msra.mxu1 %v5076_v10 }
  0x6f   : > { %4616 = vmatmul.mubr.msk.bf16.gmra.mrb[4].mxu0 %vm405_vm1, %v4023_v5  ;;  %4731 = vmatprep.subr.bf16.mxu1 %v5729_v6 }
  0x70   : > { %4621 = vmatprep.mubr.msk.bf16.mxu0 %vm405_vm1, %v6365_v17 }
  0x77   : > { %4622 = vmatmul.mubr.msk.bf16.vlgmr.msra.gmra.mrb[0].mxu0 %vm405_vm1, %v6367_v25 }
  0x78   : > { %4630 = vmatpush3.bf16.msra.mxu0 %v1403_v35  ;;  %4625 = vmatprep.mubr.msk.bf16.mxu0 %vm405_vm1, %v6368_v2 }
  0x79   : > { %5051 = vmatprep.subr.msk.bf16.mxu0 %vm418_vm0, %v4048_v45  ;;  %v4111_v45 = vrot.slane %v5755_v54, 9 }
  0x7f   : > { %4626 = vmatmul.mubr.msk.bf16.gmra.mrb[4].mxu0 %vm405_vm1, %v6369_v20  ;;  %v5761_v20 = vrot.slane %v1915_v21, 4 }
  0x80   : > { %4631 = vmatprep.mubr.msk.bf16.mxu0 %vm405_vm1, %v6372_v19  ;;  %v1764_v19 = vld [vmem:[#allocation2 + $0x18] sm:$0xf] }
  0x87   : > { %4632 = vmatmul.mubr.msk.bf16.vlgmr.msra.gmra.mrb[0].mxu0 %vm405_vm1, %v6375_v56 }
  0x88   : > { %4640 = vmatpush3.bf16.msra.mxu0 %v1515_v28  ;;  %4635 = vmatprep.mubr.msk.bf16.mxu0 %vm405_vm1, %v6378_v61  ;;  %v1767_v28 = vld [vmem:[#allocation2 + $0x1c] sm:$0x1] }
  0x89   : > { %4659 = vmatprep.subr.bf16.mxu0 %v5065_v1 }
  0x8f   : > { %4636 = vmatmul.mubr.msk.bf16.gmra.mrb[4].mxu0 %vm405_vm1, %v6379_v52  ;;  %v1749_v52 = vld [vmem:[#allocation2 + $0x8] sm:$0xf] }
  0x90   : > { %4641 = vmatprep.mubr.msk.bf16.mxu0 %vm405_vm1, %v6380_v27 }
  0x97   : > { %4642 = vmatmul.mubr.msk.bf16.vlgmr.msra.gmra.mrb[0].mxu0 %vm405_vm1, %v6383_v63 }
  0x98   : > { %4645 = vmatprep.mubr.msk.bf16.mxu0 %vm405_vm1, %v6384_v38  ;;  %4660 = vmatpush3.bf16.msra.mxu0 %v5065_v1  ;;  %v1755_v1 = vld [vmem:[#allocation2 + $0xc] sm:$0x1] }
  0x99   : > { %4661 = vmatprep.subr.bf16.mxu0 %v5067_v50  ;;  %v5080_v38 = vld [vmem:[%s6340_s3 + $0xc8] sm:$0xff]  }
  0x9c   : > { %4662 = vmatpush3.bf16.msra.mxu0 %v5067_v50 }
  0x9d   : > { %4663 = vmatprep.subr.bf16.mxu0 %v5069_v34 }
  0x9f   : > { %4646 = vmatmul.mubr.msk.bf16.gmra.mrb[4].mxu0 %vm405_vm1, %v4052_v60 }
  0xa0   : > { %4664 = vmatpush3.bf16.msra.mxu0 %v5069_v34 }
  0xa1   : > { %4665 = vmatprep.subr.bf16.mxu0 %v5071_v0 }
  0xa4   : > { %4666 = vmatpush3.bf16.msra.mxu0 %v5071_v0 }
  0xa5   : > { %4667 = vmatprep.subr.bf16.mxu0 %v5073_v14 }
  0xa8   : > { %4668 = vmatpush3.bf16.msra.mxu0 %v5073_v14 }
  0xa9   : > { %4669 = vmatprep.subr.bf16.mxu0 %v5075_v15 }
  0xac   : > { %4670 = vmatpush3.bf16.msra.mxu0 %v5075_v15 }
  0xad   : > { %4671 = vmatprep.subr.bf16.mxu0 %v5077_v12 }
  0xb0   : > { %4672 = vmatpush3.bf16.msra.mxu0 %v5077_v12  ;;  %v1773_v12 = vld [vmem:[#allocation2 + $0x24] sm:$0x1] }
  0xb1   : > { %4673 = vmatprep.subr.bf16.mxu0 %v5079_v16 }
  0xb4   : > { %4674 = vmatpush3.bf16.msra.mxu0 %v5079_v16 }
  0xb5   : > { %4683 = vmatprep.subr.bf16.mxu0 %v5738_v41 }
 0x16a   : > { %v4643_v4 = vpop.f32.mrb[0].mxu0 }
 0x16b   : > { %v1599_v60 = vadd.f32 %v4643_v4, %v5748_v13  ;;  %v1551_v9 = vpop.f32.mrb[1].mxu0 }
 0x16c   : > { %v1597_v62 = vadd.f32 %v5748_v13, %v1551_v9  ;;  %v4644_v43 = vpop.f32.mrb[2].mxu0  ;;  %v1761_v9 = vld [vmem:[#allocation2 + $0x14] sm:$0x1] }
 0x16d   : > { %v1607_v7 = vmax.f32 %v1599_v60, 0.0  ;;  %v1600_v47 = vadd.f32 %v4644_v43, %v5748_v13  ;;  %v1554_v24 = vpop.f32.mrb[3].mxu0  ;;  %v1758_v60 = vld [vmem:[#allocation2 + $0x10] sm:$0xf] }
 0x16e   : > { %v1605_v44 = vmax.f32 %v1597_v62, 0.0  ;;  %v1598_v11 = vadd.f32 %v5748_v13, %v1554_v24 }
 0x16f   : > { %v4395_v3 = vpack.c.bf16 %v1607_v7, %v1607_v7  ;;  %v1608_v5 = vmax.f32 %v1600_v47, 0.0 }
 0x170   : > { %v4393_v17 = vpack.c.bf16 %v1605_v44, %v1605_v44  ;;  %v1606_v35 = vmax.f32 %v1598_v11, 0.0 }
 0x171   : > { %v1682_v25 = vshrl.u32 %v4395_v3, 16  ;;  %v4396_v2 = vpack.c.bf16 %v1608_v5, %v1608_v5  ;;  %v1685_v33 = vshll.u32 %v4395_v3, 16 }
 0x172   : > { %v1666_v37 = vshrl.u32 %v4393_v17, 16  ;;  %v1669_v40 = vshll.u32 %v4393_v17, 16  ;;  %v4394_v56 = vpack.c.bf16 %v1606_v35, %v1606_v35  ;;  %v4647_v29 = vpop.f32.mrb[4].mxu0 }
 0x173   : > { %v1684_v51 = vrot.slane %v1682_v25, 7  ;;  %v1690_v27 = vshrl.u32 %v4396_v2, 16  ;;  %v1693_v42 = vshll.u32 %v4396_v2, 16  ;;  %v1603_v59 = vadd.f32 %v4647_v29, %v5748_v13  ;;  %v1567_v63 = vpop.f32.mrb[5].mxu0 }
 0x174   : > { %v1668_v18 = vrot.slane %v1666_v37, 7  ;;  %v1674_v26 = vshrl.u32 %v4394_v56, 16  ;;  %v1677_v53 = vshll.u32 %v4394_v56, 16  ;;  %v1601_v50 = vadd.f32 %v5748_v13, %v1567_v63  ;;  %v4648_v39 = vpop.f32.mrb[6].mxu0 }
 0x175   : > { %v1687_v34 = vor.u32 %v1685_v33, %v1684_v51  ;;  %v1688_v55 = vrot.slane %v1684_v51, 4  ;;  %v1692_v0 = vrot.slane %v1690_v27, 7  ;;  %v1611_v14 = vmax.f32 %v1603_v59, 0.0  ;;  %v1570_v8 = vpop.f32.mrb[7].mxu0  ;;  %v1791_v51 = vld [vmem:[#allocation2 + $0x3c] sm:$0x1] }
 0x176   : > { %v1671_v15 = vor.u32 %v1669_v40, %v1668_v18  ;;  %v1672_v10 = vrot.slane %v1668_v18, 4  ;;  %v1676_v16 = vrot.slane %v1674_v26, 7  ;;  %v1609_v57 = vmax.f32 %v1601_v50, 0.0  ;;  %v1788_v40 = vld [vmem:[#allocation2 + $0x38] sm:$0xf] }
 0x177   : > { %v1765_v31 = vsel %vm5767_vm11, %v1687_v34, %v1764_v19  ;;  %v1768_v36 = vsel %vm5774_vm12, %v1688_v55, %v1767_v28  ;;  %v1695_v46 = vor.u32 %v1693_v42, %v1692_v0  ;;  %v1696_v4 = vrot.slane %v1692_v0, 4 }
 0x178   : > { %1766 = vst [vmem:[#allocation2 + $0x18] sm:$0xf] %v1765_v31  ;;  %1769 = vst [vmem:[#allocation2 + $0x1c] sm:$0x1] %v1768_v36  ;;  %v1750_v62 = vsel %vm5767_vm11, %v1671_v15, %v1749_v52  ;;  %v1756_v43 = vsel %vm5774_vm12, %v1672_v10, %v1755_v1  ;;  %v1679_v7 = vor.u32 %v1677_v53, %v1676_v16  ;;  %v1680_v47 = vrot.slane %v1676_v16, 4 }
 0x179   : > { %1751 = vst [vmem:[#allocation2 + $0x8] sm:$0xf] %v1750_v62  ;;  %1757 = vst [vmem:[#allocation2 + $0xc] sm:$0x1] %v1756_v43  ;;  %v1771_v24 = vsel %vm5767_vm11, %v1695_v46, %v1770_v23  ;;  %v1774_v21 = vsel %vm5774_vm12, %v1696_v4, %v1773_v12  ;;  %v4399_v49 = vpack.c.bf16 %v1611_v14, %v1611_v14  ;;  %v1776_v52 = vld [vmem:[#allocation2 + $0x28] sm:$0xf] }
 0x17a   : > { %v4397_v44 = vpack.c.bf16 %v1609_v57, %v1609_v57  ;;  %1772 = vst [vmem:[#allocation2 + $0x20] sm:$0xf] %v1771_v24  ;;  %1775 = vst [vmem:[#allocation2 + $0x24] sm:$0x1] %v1774_v21  ;;  %v1759_v11 = vsel %vm5767_vm11, %v1679_v7, %v1758_v60  ;;  %v1762_v3 = vsel %vm5774_vm12, %v1680_v47, %v1761_v9  ;;  %v1797_v15 = vld [vmem:[#allocation2 + $0x44] sm:$0x1] }
 0x17b   : > { %v1604_v5 = vadd.f32 %v4648_v39, %v5748_v13  ;;  %v1602_v17 = vadd.f32 %v5748_v13, %v1570_v8  ;;  %1760 = vst [vmem:[#allocation2 + $0x10] sm:$0xf] %v1759_v11  ;;  %1763 = vst [vmem:[#allocation2 + $0x14] sm:$0x1] %v1762_v3  ;;  %v1714_v35 = vshrl.u32 %v4399_v49, 16  ;;  %v1717_v37 = vshll.u32 %v4399_v49, 16 }
 0x17c   : > { %v1698_v25 = vshrl.u32 %v4397_v44, 16  ;;  %v1701_v29 = vshll.u32 %v4397_v44, 16  ;;  %v1779_v13 = vld [vmem:[#allocation2 + $0x2c] sm:$0x1]  ;;  %v5809_v59 = vsel %vm5799_vm13, %v4111_v45, %v2332_v48  ;;  %v1921_v63 = vsel %vm5337_vm4, %v5761_v20, %v5763_v22  ;;  %v1794_v8 = vld [vmem:[#allocation2 + $0x40] sm:$0xf] }
 0x17d   : > { %v1612_v33 = vmax.f32 %v1604_v5, 0.0  ;;  %v1610_v19 = vmax.f32 %v1602_v17, 0.0  ;;  %v1716_v28 = vrot.slane %v1714_v35, 7  ;;  %v1782_v10 = vld [vmem:[#allocation2 + $0x30] sm:$0xf] }
 0x17e   : > { %v1700_v56 = vrot.slane %v1698_v25, 7  ;;  %v1785_v12 = vld [vmem:[#allocation2 + $0x34] sm:$0x1] }
 0x17f   : > { %v4400_v27 = vpack.c.bf16 %v1612_v33, %v1612_v33  ;;  %v4398_v42 = vpack.c.bf16 %v1610_v19, %v1610_v19  ;;  %v1719_v18 = vor.u32 %v1717_v37, %v1716_v28  ;;  %v1720_v1 = vrot.slane %v1716_v28, 4  ;;  %v5815_v50 = vld [vmem:[#allocation2 + $0x1c] sm:$0x1]  ;;  %v2306_v39 = vld [vmem:[#allocation2 + $0x18] sm:$0xe] }
 0x180   : > { %v1703_v26 = vor.u32 %v1701_v29, %v1700_v56  ;;  %v1704_v53 = vrot.slane %v1700_v56, 4  ;;  %v1901_v0 = vld [vmem:[#allocation2 + $0xc] sm:$0x1]  ;;  %v2304_v16 = vld [vmem:[#allocation2 + $0x8] sm:$0xe]  ;;  %v4114_v43 = vrot.slane %v2306_v39, 9 }
 0x181   : > { %v1722_v34 = vshrl.u32 %v4400_v27, 16  ;;  %v1725_v30 = vshll.u32 %v4400_v27, 16  ;;  %v1706_v55 = vshrl.u32 %v4398_v42, 16  ;;  %v1709_v54 = vshll.u32 %v4398_v42, 16  ;;  %v5825_v57 = vld [vmem:[#allocation2 + $0x8] sm:$0xf] }
 0x182   : > { %v1789_v45 = vsel %vm5767_vm11, %v1719_v18, %v1788_v40  ;;  %v1792_v48 = vsel %vm5774_vm12, %v1720_v1, %v1791_v51  ;;  %v1777_v23 = vsel %vm5767_vm11, %v1703_v26, %v1776_v52  ;;  %v1780_v14 = vsel %vm5774_vm12, %v1704_v53, %v1779_v13  ;;  %v1902_v60 = vld [vmem:[#allocation2 + $0x14] sm:$0x1]  ;;  %v2305_v9 = vld [vmem:[#allocation2 + $0x10] sm:$0xe]  ;;  %v5843_v37 = vld [vmem:[#allocation2 + $0x18] sm:$0xf] }
 0x183   : > { %1790 = vst [vmem:[#allocation2 + $0x38] sm:$0xf] %v1789_v45  ;;  %1793 = vst [vmem:[#allocation2 + $0x3c] sm:$0x1] %v1792_v48  ;;  %v1724_v31 = vrot.slane %v1722_v34, 7  ;;  %v1708_v36 = vrot.slane %v1706_v55, 7 }
 0x184   : > { %1778 = vst [vmem:[#allocation2 + $0x28] sm:$0xf] %v1777_v23  ;;  %1781 = vst [vmem:[#allocation2 + $0x2c] sm:$0x1] %v1780_v14  ;;  %v4112_v46 = vrot.slane %v2304_v16, 9  ;;  %v2336_v4 = vrot.slane %v1901_v0, 5 }
 0x185   : > { %v2340_v62 = vrot.slane %v1902_v60, 5  ;;  %v2344_v7 = vrot.slane %v5815_v50, 5  ;;  %v1923_v47 = vshrl.u32 %v5825_v57, 16  ;;  %v1727_v24 = vor.u32 %v1725_v30, %v1724_v31  ;;  %v5833_v35 = vld [vmem:[#allocation2 + $0x10] sm:$0xf] }
 0x186   : > { %v1728_v21 = vrot.slane %v1724_v31, 4  ;;  %v1711_v49 = vor.u32 %v1709_v54, %v1708_v36  ;;  %v1712_v44 = vrot.slane %v1708_v36, 4  ;;  %v2337_v11 = vsel %vm5799_vm13, %v4112_v46, %v2336_v4  ;;  %v5849_v52 = vld [vmem:[#allocation2 + $0x24] sm:$0x1]  ;;  %v2307_v18 = vld [vmem:[#allocation2 + $0x20] sm:$0xe] }
 0x187   : > { %v4113_v3 = vrot.slane %v2305_v9, 9  ;;  %v2345_v5 = vsel %vm5799_vm13, %v4114_v43, %v2344_v7  ;;  %v1925_v17 = vrot.slane %v1923_v47, 4  ;;  %v1795_v25 = vsel %vm5767_vm11, %v1727_v24, %v1794_v8  ;;  %v5082_v31 = vld [vmem:[%s6340_s3 + $0xd0] sm:$0xff]  }
 0x188   : > { %v1798_v33 = vsel %vm5774_vm12, %v1728_v21, %v1797_v15  ;;  %v1783_v19 = vsel %vm5767_vm11, %v1711_v49, %v1782_v10  ;;  %v1786_v28 = vsel %vm5774_vm12, %v1712_v44, %v1785_v12  ;;  %1796 = vst [vmem:[#allocation2 + $0x40] sm:$0xf] %v1795_v25  ;;  %v4135_v40 = vcombine.low %v5809_v59, %v2337_v11 }
 0x189   : > { %1799 = vst [vmem:[#allocation2 + $0x44] sm:$0x1] %v1798_v33  ;;  %1784 = vst [vmem:[#allocation2 + $0x30] sm:$0xf] %v1783_v19  ;;  %v2341_v56 = vsel %vm5799_vm13, %v4113_v3, %v2340_v62  ;;  %v1926_v29 = vshll.u32 %v5825_v57, 16  ;;  %v1932_v51 = vshll.u32 %v1901_v0, 16 }
 0x18a   : > { %1787 = vst [vmem:[#allocation2 + $0x34] sm:$0x1] %v1786_v28  ;;  %v4136_v61 = vcombine.low %v2341_v56, %v2345_v5  ;;  %v1937_v13 = vshrl.u32 %v5833_v35, 16  ;;  %v1940_v27 = vshll.u32 %v5833_v35, 16  ;;  %v1946_v42 = vshll.u32 %v1902_v60, 16  ;;  %4723 = vmatprep.mubr.bf16.mxu1 %v4135_v40  ;;  %v5085_v33 = vld [vmem:[%s6340_s3 + $0xd8] sm:$0xff]  }
 0x18b   : > { %v1928_v59 = vrot.slane %v1926_v29, 5  ;;  %v1934_v1 = vrot.slane %v1932_v51, 5  ;;  %v1951_v26 = vshrl.u32 %v5843_v37, 16  ;;  %v1954_v53 = vshll.u32 %v5843_v37, 16  ;;  %v5858_v39 = vld [vmem:[#allocation2 + $0x2c] sm:$0x1] }
 0x18c   : > { %4724 = vmatmul.mubr.bf16.vlgmr.msra.gmra.mrb[8].mxu1 %v4136_v61  ;;  %v1939_v34 = vrot.slane %v1937_v13, 4  ;;  %v1942_v30 = vrot.slane %v1940_v27, 5  ;;  %v1948_v55 = vrot.slane %v1946_v42, 5  ;;  %v1960_v54 = vshll.u32 %v5815_v50, 16  ;;  %v2308_v0 = vld [vmem:[#allocation2 + $0x28] sm:$0xe] }
 0x18d   : > { %4732 = vmatpush3.bf16.msra.mxu1 %v5729_v6  ;;  %v1929_v45 = vor.u32 %v1928_v59, %v1925_v17  ;;  %v1953_v48 = vrot.slane %v1951_v26, 4  ;;  %v1956_v23 = vrot.slane %v1954_v53, 5  ;;  %v4115_v14 = vrot.slane %v2307_v18, 9  ;;  %v5862_v8 = vld [vmem:[#allocation2 + $0x3c] sm:$0x1]  ;;  %v5083_v29 = vld [vmem:[%s6340_s3 + $0x8] sm:$0xff]  }
 0x18e   : > { %4733 = vmatprep.subr.bf16.mxu1 %v5080_v38  ;;  %v1943_v15 = vor.u32 %v1942_v30, %v1939_v34  ;;  %v1962_v10 = vrot.slane %v1960_v54, 5  ;;  %v2348_v12 = vrot.slane %v5849_v52, 5  ;;  %v4116_v16 = vrot.slane %v2308_v0, 9  ;;  %v2310_v50 = vld [vmem:[#allocation2 + $0x38] sm:$0xe]  ;;  %v5088_v53 = vld [vmem:[%s6340_s3 + $0xe0] sm:$0xff]  }
 0x18f   : > { %v1930_v36 = vrot.slane %v1929_v45, 4  ;;  %v1957_v46 = vor.u32 %v1956_v23, %v1953_v48  ;;  %v2352_v6 = vrot.slane %v5858_v39, 5  ;;  %v4118_v4 = vrot.slane %v2310_v50, 9  ;;  %v5869_v60 = vld [vmem:[#allocation2 + $0x20] sm:$0xf] }
 0x190   : > { %v1944_v9 = vrot.slane %v1943_v15, 4  ;;  %v2349_v62 = vsel %vm5799_vm13, %v4115_v14, %v2348_v12  ;;  %v2309_v7 = vld [vmem:[#allocation2 + $0x30] sm:$0xe]  ;;  %v2360_v47 = vrot.slane %v5862_v8, 5  ;;  %v5880_v11 = vld [vmem:[#allocation2 + $0x28] sm:$0xf] }
 0x191   : > { %v5873_v43 = vld [vmem:[#allocation2 + $0x34] sm:$0x1]  ;;  %v1935_v24 = vsel %vm5337_vm4, %v1930_v36, %v1934_v1  ;;  %4734 = vmatpush3.bf16.msra.mxu1 %v5080_v38  ;;  %v1958_v21 = vrot.slane %v1957_v46, 4  ;;  %v2353_v49 = vsel %vm5799_vm13, %v4116_v16, %v2352_v6  ;;  %v4117_v44 = vrot.slane %v2309_v7, 9  ;;  %v5897_v20 = vld [vmem:[#allocation2 + $0x30] sm:$0xf] }
 0x192   : > { %v4087_v3 = vcombine.low %v1921_v63, %v1935_v24  ;;  %v1949_v5 = vsel %vm5337_vm4, %v1944_v9, %v1948_v55  ;;  %v4137_v17 = vcombine.low %v2349_v62, %v2353_v49  ;;  %4735 = vmatprep.subr.bf16.mxu1 %v5082_v31  ;;  %v2356_v25 = vrot.slane %v5873_v43, 5  ;;  %v5908_v42 = vld [vmem:[#allocation2 + $0x38] sm:$0xf]  ;;  %v5084_v18 = vld [vmem:[#allocation2 + $0x8] ss:$8 sps:$4 sm:$0xff]  }
 0x193   : > { %v1963_v19 = vsel %vm5337_vm4, %v1958_v21, %v1962_v10  ;;  %v1965_v28 = vshrl.u32 %v5869_v60, 16  ;;  %v1968_v40 = vshll.u32 %v5869_v60, 16  ;;  %v2361_v56 = vsel %vm5799_vm13, %v4118_v4, %v2360_v47  ;;  %v5090_v16 = vld [vmem:[%s6340_s3 + $0xe8] sm:$0xff]   ;;  %v5089_v4 = vld [vmem:[%s6340_s3 + $0x18] sm:$0xff]   ;;  %v2688_v7 = vld [vmem:[#allocation2 + $0x10] sm:$0xf] }
 0x194   : > { %4675 = vmatprep.mubr.bf16.mxu0 %v4087_v3  ;;  %v4088_v22 = vcombine.low %v1949_v5, %v1963_v19  ;;  %4727 = vmatprep.mubr.bf16.mxu1 %v4137_v17  ;;  %v2357_v63 = vsel %vm5799_vm13, %v4117_v44, %v2356_v25  ;;  %v1979_v51 = vshrl.u32 %v5880_v11, 16  ;;  %v1982_v27 = vshll.u32 %v5880_v11, 16  ;;  %v5092_v49 = vld [vmem:[%s6340_s3 + $0xf0] sm:$0xff]   ;;  %v2686_v3 = vld [vmem:[#allocation2 + $0x8] sm:$0xf]  ;;  %v5091_v19 = vld [vmem:[%s6340_s3 + $0x20] sm:$0xff]  }
 0x195   : > { %v4138_v61 = vcombine.low %v2357_v63, %v2361_v56  ;;  %4736 = vmatpush3.bf16.msra.mxu1 %v5082_v31  ;;  %v1967_v38 = vrot.slane %v1965_v28, 4  ;;  %v1970_v13 = vrot.slane %v1968_v40, 5  ;;  %v1974_v59 = vshll.u32 %v5849_v52, 16  ;;  %v5086_v52 = vld [vmem:[%s6340_s3 + $0x10] sm:$0xff]   ;;  %v5094_v40 = vld [vmem:[%s6340_s3 + $0xf8] sm:$0xff]  }
 0x196   : > { %4676 = vmatmul.mubr.bf16.vlgmr.msra.gmra.mrb[8].mxu0 %v4088_v22  ;;  %4737 = vmatprep.subr.bf16.mxu1 %v5085_v33  ;;  %v1981_v1 = vrot.slane %v1979_v51, 4  ;;  %v1993_v26 = vshrl.u32 %v5897_v20, 16  ;;  %v1984_v30 = vrot.slane %v1982_v27, 5  ;;  %v1988_v55 = vshll.u32 %v5858_v39, 16  ;;  %v5093_v51 = vld [vmem:[%s6340_s3 + $0x28] sm:$0xff]   ;;  %v5095_v27 = vld [vmem:[%s6340_s3 + $0x30] sm:$0xff]  }
 0x197   : > { %4684 = vmatpush3.bf16.msra.mxu0 %v5738_v41  ;;  %4728 = vmatmul.mubr.bf16.gmra.mrb[12].mxu1 %v4138_v61  ;;  %v1971_v34 = vor.u32 %v1970_v13, %v1967_v38  ;;  %v1996_v54 = vshll.u32 %v5897_v20, 16  ;;  %v2007_v45 = vshrl.u32 %v5908_v42, 16  ;;  %v2010_v48 = vshll.u32 %v5908_v42, 16  ;;  %v5956_v38 = vld [vmem:[#allocation2 + $0x14] sm:$0x1] }
 0x198   : > { %4685 = vmatprep.subr.bf16.mxu0 %v5083_v29  ;;  %4747 = vmatprep.mubr.bf16.mxu1 %v5084_v18  ;;  %v1995_v0 = vrot.slane %v1993_v26, 4  ;;  %v1985_v41 = vor.u32 %v1984_v30, %v1981_v1  ;;  %v2002_v15 = vshll.u32 %v5873_v43, 16  ;;  %v2016_v12 = vshll.u32 %v5862_v8, 16  ;;  %v5961_v18 = vld [vmem:[#allocation2 + $0xc] sm:$0x1] }
 0x199   : > { %v1972_v23 = vrot.slane %v1971_v34, 4  ;;  %4738 = vmatpush3.bf16.msra.mxu1 %v5085_v33  ;;  %v1998_v14 = vrot.slane %v1996_v54, 5  ;;  %v2009_v39 = vrot.slane %v2007_v45, 4  ;;  %v2012_v10 = vrot.slane %v2010_v48, 5  ;;  %v5100_v34 = vld [vmem:[%s6340_s3 + $0x108] sm:$0xff]  }
 0x19a   : > { %4739 = vmatprep.subr.bf16.mxu1 %v5088_v53  ;;  %v1976_v31 = vrot.slane %v1974_v59, 5  ;;  %v1986_v50 = vrot.slane %v1985_v41, 4  ;;  %v1990_v36 = vrot.slane %v1988_v55, 5  ;;  %v2004_v43 = vrot.slane %v2002_v15, 5  ;;  %v5096_v59 = vld [vmem:[#allocation2 + $0x18] ss:$8 sps:$4 sm:$0xff]  }
 0x19b   : > { %4686 = vmatpush3.bf16.msra.mxu0 %v5083_v29  ;;  %v1999_v46 = vor.u32 %v1998_v14, %v1995_v0  ;;  %v2013_v6 = vor.u32 %v2012_v10, %v2009_v39  ;;  %v2018_v21 = vrot.slane %v2016_v12, 5  ;;  %v2717_v17 = vshrl.u32 %v2688_v7, 16  ;;  %v2690_v30 = vld [vmem:[#allocation2 + $0x18] sm:$0xf]  ;;  %v5105_v0 = vld [vmem:[%s6340_s3 + $0x110] sm:$0xff]   ;;  %v5979_v10 = vld [vmem:[%s6340_s3 + $0x200] sm:$0xff]  }
 0x19c   : > { %4687 = vmatprep.subr.bf16.mxu0 %v5086_v52  ;;  %v1977_v9 = vsel %vm5337_vm4, %v1972_v23, %v1976_v31  ;;  %v1991_v8 = vsel %vm5337_vm4, %v1986_v50, %v1990_v36  ;;  %v2720_v25 = vshll.u32 %v2688_v7, 16  ;;  %v4099_v28 = vcombine.low %v5741_v32, %v5825_v57  ;;  %v5097_v32 = vld [vmem:[%s6340_s3 + $0x100] sm:$0xff]   ;;  %v5099_v55 = vld [vmem:[%s6340_s3 + $0x38] sm:$0xff]   ;;  %v5974_v45 = vld [vmem:[#allocation2 + $0x14] sm:$0x1] }
 0x19d   : > { %v2000_v62 = vrot.slane %v1999_v46, 4  ;;  %4740 = vmatpush3.bf16.msra.mxu1 %v5088_v53  ;;  %v4089_v47 = vcombine.low %v1977_v9, %v1991_v8  ;;  %v2014_v24 = vrot.slane %v2013_v6, 4  ;;  %v2703_v22 = vshrl.u32 %v2686_v3, 16  ;;  %v5098_v53 = vld [vmem:[#allocation2 + $0x28] ss:$8 sps:$4 sm:$0xff]  }
 0x19e   : > { %4741 = vmatprep.subr.bf16.mxu1 %v5090_v16  ;;  %v2706_v63 = vshll.u32 %v2686_v3, 16  ;;  %v2719_v56 = vrot.slane %v2717_v17, 4  ;;  %v2722_v29 = vrot.slane %v2720_v25, 5  ;;  %v2726_v26 = vshll.u32 %v5956_v38, 16  ;;  %v3631_v48 = vld [vmem:[#allocation2 + $0x10] sm:$0xe] }
 0x19f   : > { %v2005_v44 = vsel %vm5337_vm4, %v2000_v62, %v2004_v43  ;;  %4688 = vmatpush3.bf16.msra.mxu0 %v5086_v52  ;;  %4679 = vmatprep.mubr.bf16.mxu0 %v4089_v47  ;;  %v2019_v5 = vsel %vm5337_vm4, %v2014_v24, %v2018_v21  ;;  %v2705_v57 = vrot.slane %v2703_v22, 4  ;;  %v2712_v54 = vshll.u32 %v5961_v18, 16  ;;  %v2692_v23 = vld [vmem:[#allocation2 + $0x20] sm:$0xf]  ;;  %v5981_v12 = vld [vmem:[#allocation2 + $0x1c] sm:$0x1] }
 0x1a0   : > { %4689 = vmatprep.subr.bf16.mxu0 %v5089_v4  ;;  %v4090_v33 = vcombine.low %v2005_v44, %v2019_v5  ;;  %v2708_v61 = vrot.slane %v2706_v63, 5  ;;  %v2723_v13 = vor.u32 %v2722_v29, %v2719_v56  ;;  %v2728_v14 = vrot.slane %v2726_v26, 5  ;;  %v5104_v31 = vld [vmem:[#allocation2 + $0x38] ss:$8 sps:$4 sm:$0xff]   ;;  %v5985_v6 = vld [vmem:[#allocation2 + $0x24] sm:$0x1] }
 0x1a1   : > { %4742 = vmatpush3.bf16.msra.mxu1 %v5090_v16  ;;  %v2731_v15 = vshrl.u32 %v2690_v30, 16  ;;  %v2734_v39 = vshll.u32 %v2690_v30, 16  ;;  %v3632_v16 = vld [vmem:[#allocation2 + $0x18] sm:$0xe]  ;;  %v2714_v50 = vrot.slane %v2712_v54, 5  ;;  %v4295_v46 = vrot.slane %v3631_v48, 9 }
 0x1a2   : > { %4743 = vmatprep.subr.bf16.mxu1 %v5092_v49  ;;  %4680 = vmatmul.mubr.bf16.gmra.mrb[12].mxu0 %v4090_v33  ;;  %v2709_v1 = vor.u32 %v2708_v61, %v2705_v57  ;;  %v2724_v52 = vrot.slane %v2723_v13, 4  ;;  %v2745_v9 = vshrl.u32 %v2692_v23, 16  ;;  %v2696_v8 = vld [vmem:[#allocation2 + $0x30] sm:$0xf]  ;;  %v2748_v47 = vshll.u32 %v2692_v23, 16  ;;  %v5998_v3 = vld [vmem:[%s6340_s3 + $0x208] sm:$0xff]  }
 0x1a3   : > { %4699 = vmatprep.mubr.bf16.mxu0 %v4099_v28  ;;  %4690 = vmatpush3.bf16.msra.mxu0 %v5089_v4  ;;  %v3657_v4 = vrot.slane %v5974_v45, 5  ;;  %v2733_v43 = vrot.slane %v2731_v15, 4  ;;  %v2736_v7 = vrot.slane %v2734_v39, 5  ;;  %v4100_v24 = vcombine.low %v5833_v35, %v5843_v37  ;;  %v2694_v44 = vld [vmem:[#allocation2 + $0x28] sm:$0xf] }
 0x1a4   : > { %4691 = vmatprep.subr.bf16.mxu0 %v5091_v19  ;;  %v2710_v41 = vrot.slane %v2709_v1, 4  ;;  %v2729_v36 = vsel %vm5337_vm4, %v2724_v52, %v2728_v14  ;;  %v4296_v5 = vrot.slane %v3632_v16, 9  ;;  %v3661_v17 = vrot.slane %v5981_v12, 5  ;;  %v6015_v56 = vld [vmem:[#allocation2 + $0x2c] sm:$0x1]  ;;  %v6037_v1 = vld [vmem:[%s6340_s3 + $0x210] sm:$0xff]  }
 0x1a5   : > { %4744 = vmatpush3.bf16.msra.mxu1 %v5092_v49  ;;  %v5107_v49 = vld [vmem:[%s6340_s3 + $0x118] sm:$0xff]   ;;  %v2773_v25 = vshrl.u32 %v2696_v8, 16  ;;  %v2776_v33 = vshll.u32 %v2696_v8, 16  ;;  %v4101_v35 = vcombine.low %v5869_v60, %v5880_v11  ;;  %v6006_v37 = vsel %vm5799_vm13, %v4295_v46, %v3657_v4  ;;  %v5110_v60 = vld [vmem:[%s6340_s3 + $0x120] sm:$0xff]   ;;  %v6020_v11 = vld [vmem:[#allocation2 + $0x34] sm:$0x1] }
 0x1a6   : > { %4745 = vmatprep.subr.bf16.mxu1 %v5094_v40  ;;  %v2715_v62 = vsel %vm5337_vm4, %v2710_v41, %v2714_v50  ;;  %v6010_v28 = vrot.slane %v2745_v9, 4  ;;  %v2737_v22 = vor.u32 %v2736_v7, %v2733_v43  ;;  %v6013_v63 = vrot.slane %v2748_v47, 5  ;;  %v5112_v30 = vld [vmem:[%s6340_s3 + $0x128] sm:$0xff]   ;;  %v2700_v48 = vld [vmem:[#allocation2 + $0x40] sm:$0xf]  ;;  %v6061_v16 = vld [vmem:[%s6340_s3 + $0x218] sm:$0xff]  }
 0x1a7   : > { %4692 = vmatpush3.bf16.msra.mxu0 %v5091_v19  ;;  %v4191_v21 = vcombine.low %v2715_v62, %v2729_v36  ;;  %v6008_v19 = vld [vmem:[#allocation2 + $0x1c] sm:$0x1]  ;;  %v2759_v29 = vshrl.u32 %v2694_v44, 16  ;;  %v3662_v57 = vsel %vm5799_vm13, %v4296_v5, %v3661_v17  ;;  %v6027_v61 = vrot.slane %v2773_v25, 4  ;;  %v3353_v39 = vld [vmem:[#allocation2 + $0x20] sm:$0xf] }
 0x1a8   : > { %4693 = vmatprep.subr.bf16.mxu0 %v5093_v51  ;;  %v6029_v13 = vrot.slane %v2776_v33, 5  ;;  %v4319_v26 = vcombine.low %v6006_v37, %v3662_v57  ;;  %v2751_v54 = vor.u32 %v6013_v63, %v6010_v28  ;;  %v2782_v23 = vshll.u32 %v6020_v11, 16  ;;  %v6066_v4 = vpop.f32.mrb[0].mxu1  ;;  %v5114_v9 = vld [vmem:[%s6340_s3 + $0x130] sm:$0xff]   ;;  %v3355_v47 = vld [vmem:[#allocation2 + $0x28] sm:$0xf] }
 0x1a9   : > { %4746 = vmatpush3.bf16.msra.mxu1 %v5094_v40  ;;  %v2754_v40 = vshll.u32 %v5985_v6, 16  ;;  %v6051_v52 = vrot.slane %v2759_v29, 4  ;;  %v3375_v50 = vshll.u32 %v5974_v45, 16  ;;  %v3389_v7 = vshll.u32 %v5981_v12, 16  ;;  %v6076_v5 = vld [vmem:[#allocation2 + $0x2c] sm:$0x1] }
 0x1aa   : > { %4755 = vmatprep.subr.bf16.mxu1 %v5097_v32  ;;  %v2801_v45 = vshrl.u32 %v2700_v48, 16  ;;  %v2804_v17 = vshll.u32 %v2700_v48, 16  ;;  %v6078_v37 = vpop.f32.mrb[1].mxu1  ;;  %v6087_v29 = vld [vmem:[%s6340_s3 + $0x220] sm:$0xff]   ;;  %v5116_v48 = vld [vmem:[%s6340_s3 + $0x138] sm:$0xff]  }
 0x1ab   : > { %4694 = vmatpush3.bf16.msra.mxu0 %v5093_v51  ;;  %v2762_v51 = vshll.u32 %v2694_v44, 16  ;;  %v3394_v44 = vshrl.u32 %v3353_v39, 16  ;;  %v3377_v33 = vrot.slane %v3375_v50, 5  ;;  %v6081_v63 = vpop.f32.mrb[2].mxu1  ;;  %v3637_v58 = vld [vmem:[#allocation2 + $0x40] sm:$0xe] }
 0x1ac   : > { %4748 = vmatmul.mubr.bf16.vlgmr.msra.gmra.mrb[8].mxu1 %v5096_v59  ;;  %4695 = vmatprep.subr.bf16.mxu0 %v5095_v27  ;;  %v3349_v59 = vld [vmem:[#allocation2 + $0x10] sm:$0xf] }
 0x1ad   : > { %4751 = vmatprep.mubr.bf16.mxu1 %v5098_v53  ;;  %4756 = vmatpush3.bf16.msra.mxu1 %v5097_v32  ;;  %v4102_v32 = vcombine.low %v5897_v20, %v5908_v42  ;;  %v2740_v20 = vshll.u32 %v6008_v19, 16  ;;  %v6041_v42 = vrot.slane %v2754_v40, 5  ;;  %v2768_v53 = vshll.u32 %v6015_v56, 16 }
 0x1ae   : > { %4757 = vmatprep.subr.bf16.mxu1 %v5100_v34  ;;  %v3366_v14 = vshrl.u32 %v3349_v59, 16  ;;  %v3369_v15 = vshll.u32 %v3349_v59, 16  ;;  %v3396_v28 = vrot.slane %v3394_v44, 4  ;;  %v3408_v40 = vshrl.u32 %v3355_v47, 16 }
 0x1af   : > { %4696 = vmatpush3.bf16.msra.mxu0 %v5095_v27  ;;  %v6031_v27 = vld [vmem:[#allocation2 + $0x38] sm:$0xf]  ;;  %v2742_v44 = vrot.slane %v2740_v20, 5 }
 0x1b0   : > { %4697 = vmatprep.subr.bf16.mxu0 %v5099_v55  ;;  %v2787_v41 = vshrl.u32 %v6031_v27, 16  ;;  %v2790_v8 = vshll.u32 %v6031_v27, 16  ;;  %v3368_v62 = vrot.slane %v3366_v14, 4  ;;  %v3371_v43 = vrot.slane %v3369_v15, 5 }
 0x1b1   : > { %4758 = vmatpush3.bf16.msra.mxu1 %v5100_v34  ;;  %v3351_v34 = vld [vmem:[#allocation2 + $0x18] sm:$0xf]  ;;  %v3410_v59 = vrot.slane %v3408_v40, 4  ;;  %v2752_v14 = vrot.slane %v2751_v54, 4  ;;  %v6107_v54 = vld [vmem:[%s6340_s3 + $0x228] sm:$0xff]   ;;  %v2784_v27 = vrot.slane %v2782_v23, 5 }
 0x1b2   : > { %4759 = vmatprep.subr.bf16.mxu1 %v5105_v0  ;;  %v3380_v36 = vshrl.u32 %v3351_v34, 16  ;;  %v3383_v46 = vshll.u32 %v3351_v34, 16  ;;  %v3372_v25 = vor.u32 %v3371_v43, %v3368_v62  ;;  %v3417_v34 = vshll.u32 %v6076_v5, 16  ;;  %v6134_v23 = vld [vmem:[%s6340_s3 + $0x230] sm:$0xff]  }
 0x1b3   : > { %4698 = vmatpush3.bf16.msra.mxu0 %v5099_v55  ;;  %v6047_v55 = vrot.slane %v2737_v22, 4  ;;  %v3411_v22 = vshll.u32 %v3355_v47, 16  ;;  %v2792_v47 = vrot.slane %v2790_v8, 5 }
 0x1b4   : > { %4752 = vmatmul.mubr.bf16.gmra.mrb[12].mxu1 %v5104_v31  ;;  %4851 = vmatprep.subr.bf16.mxu0 %v5979_v10  ;;  %v2779_v31 = vor.u32 %v6029_v13, %v6027_v61  ;;  %v6090_v61 = vpop.f32.mrb[3].mxu1 }
 0x1b5   : > { %4771 = vmatprep.mubr.bf16.mxu1 %v4191_v21  ;;  %4760 = vmatpush3.bf16.msra.mxu1 %v5105_v0  ;;  %v6053_v0 = vrot.slane %v2762_v51, 5  ;;  %v3382_v21 = vrot.slane %v3380_v36, 4  ;;  %v3373_v51 = vrot.slane %v3372_v25, 4  ;;  %v2806_v36 = vrot.slane %v2804_v17, 5  ;;  %v5118_v17 = vld [vmem:[%s6340_s3 + $0x140] sm:$0xff]  }
 0x1b6   : > { %4700 = vmatmul.mubr.bf16.vlgmr.msra.gmra.mrb[8].mxu0 %v4100_v24  ;;  %4761 = vmatprep.subr.bf16.mxu1 %v5107_v49  ;;  %v6074_v24 = vld [vmem:[#allocation2 + $0x24] sm:$0x1] }
 0x1b7   : > { %4703 = vmatprep.mubr.bf16.mxu0 %v4101_v35  ;;  %4852 = vmatpush3.bf16.msra.mxu0 %v5979_v10  ;;  %v3397_v35 = vshll.u32 %v3353_v39, 16  ;;  %v3403_v57 = vshll.u32 %v6074_v24, 16  ;;  %v2765_v15 = vor.u32 %v6053_v0, %v6051_v52  ;;  %v3378_v39 = vsel %vm5337_vm4, %v3373_v51, %v3377_v33  ;;  %v2969_v51 = vld [vmem:[#allocation2 + $0x10] sm:$0xe] }
 0x1b8   : > { %4853 = vmatprep.subr.bf16.mxu0 %v5998_v3  ;;  %v2780_v52 = vrot.slane %v2779_v31, 4  ;;  %v2789_v0 = vrot.slane %v2787_v41, 4  ;;  %v6120_v41 = vld [vmem:[#allocation2 + $0x44] sm:$0x1]  ;;  %v2770_v33 = vrot.slane %v2768_v53, 5 }
 0x1b9   : > { %4762 = vmatpush3.bf16.msra.mxu1 %v5107_v49  ;;  %v3385_v49 = vrot.slane %v3383_v46, 5  ;;  %v2766_v31 = vrot.slane %v2765_v15, 4  ;;  %v2998_v15 = vrot.slane %v5956_v38, 5 }
 0x1ba   : > { %4763 = vmatprep.subr.bf16.mxu1 %v5110_v60  ;;  %v2793_v40 = vor.u32 %v2792_v47, %v2789_v0 }
 0x1bb   : > { %4854 = vmatpush3.bf16.msra.mxu0 %v5998_v3  ;;  %v3386_v12 = vor.u32 %v3385_v49, %v3382_v21  ;;  %v3419_v49 = vrot.slane %v3417_v34, 5  ;;  %v2771_v53 = vsel %vm5337_vm4, %v2766_v31, %v2770_v33  ;;  %v6159_v34 = vld [vmem:[%s6340_s3 + $0x238] sm:$0xff]   ;;  %v5124_v33 = vld [vmem:[%s6340_s3 + $0x168] sm:$0xff]  }
 0x1bc   : > { %4855 = vmatprep.subr.bf16.mxu0 %v6037_v1 }
 0x1bd   : > { %4764 = vmatpush3.bf16.msra.mxu1 %v5110_v60  ;;  %v3391_v60 = vrot.slane %v3389_v7, 5  ;;  %v3387_v13 = vrot.slane %v3386_v12, 4 }
 0x1be   : > { %4704 = vmatmul.mubr.bf16.gmra.mrb[12].mxu0 %v4102_v32  ;;  %4765 = vmatprep.subr.bf16.mxu1 %v5112_v30  ;;  %v3399_v32 = vrot.slane %v3397_v35, 5  ;;  %v6140_v35 = vld [vmem:[#allocation2 + $0x3c] sm:$0x1] }
 0x1bf   : > { %4856 = vmatpush3.bf16.msra.mxu0 %v6037_v1  ;;  %4867 = vmatprep.mubr.bf16.mxu0 %v4319_v26  ;;  %v3413_v26 = vrot.slane %v3411_v22, 5  ;;  %v3392_v46 = vsel %vm5337_vm4, %v3387_v13, %v3391_v60  ;;  %v2810_v22 = vshll.u32 %v6120_v41, 16 }
 0x1c0   : > { %4857 = vmatprep.subr.bf16.mxu0 %v6061_v16  ;;  %v3400_v50 = vor.u32 %v3399_v32, %v3396_v28  ;;  %v6111_v43 = vcombine.low %v3378_v39, %v3392_v46  ;;  %v2743_v28 = vsel %vm5337_vm4, %v6047_v55, %v2742_v44  ;;  %v5120_v32 = vld [vmem:[%s6340_s3 + $0x148] sm:$0xff]   ;;  %v6162_v39 = vpop.f32.mrb[4].mxu1 }
 0x1c1   : > { %4766 = vmatpush3.bf16.msra.mxu1 %v5112_v30  ;;  %v2803_v30 = vrot.slane %v2801_v45, 4  ;;  %v3414_v62 = vor.u32 %v3413_v26, %v3410_v59  ;;  %v3405_v45 = vrot.slane %v3403_v57, 5  ;;  %v3634_v57 = vld [vmem:[#allocation2 + $0x28] sm:$0xe]  ;;  %v2796_v59 = vshll.u32 %v6140_v35, 16 }
 0x1c2   : > { %4767 = vmatprep.subr.bf16.mxu1 %v5114_v9  ;;  %v3401_v7 = vrot.slane %v3400_v50, 4  ;;  %v2968_v26 = vld [vmem:[#allocation2 + $0x8] sm:$0xe]  ;;  %v4298_v50 = vrot.slane %v3634_v57, 9  ;;  %v2812_v46 = vrot.slane %v2810_v22, 5  ;;  %v5126_v22 = vld [vmem:[%s6340_s3 + $0x178] sm:$0xff]  }
 0x1c3   : > { %4858 = vmatpush3.bf16.msra.mxu0 %v6061_v16  ;;  %v3415_v21 = vrot.slane %v3414_v62, 4  ;;  %v2807_v8 = vor.u32 %v2806_v36, %v2803_v30  ;;  %v3669_v30 = vrot.slane %v6076_v5, 5  ;;  %v2794_v36 = vrot.slane %v2793_v40, 4  ;;  %v6165_v62 = vpop.f32.mrb[5].mxu1  ;;  %v2973_v40 = vld [vmem:[#allocation2 + $0x30] sm:$0xe] }
 0x1c4   : > { %4859 = vmatprep.subr.bf16.mxu0 %v6087_v29  ;;  %v3406_v20 = vsel %vm5337_vm4, %v3401_v7, %v3405_v45  ;;  %v4203_v0 = vrot.slane %v2968_v26, 9  ;;  %v2994_v7 = vrot.slane %v5961_v18, 5  ;;  %v6171_v38 = vpop.f32.mrb[6].mxu1  ;;  %v3665_v45 = vrot.slane %v6074_v24, 5  ;;  %v5127_v26 = vld [vmem:[%s6340_s3 + $0x180] sm:$0xff]  }
 0x1c5   : > { %4768 = vmatpush3.bf16.msra.mxu1 %v5114_v9  ;;  %v2757_v9 = vsel %vm5337_vm4, %v2752_v14, %v6041_v42  ;;  %v3420_v25 = vsel %vm5337_vm4, %v3415_v21, %v3419_v49  ;;  %v2785_v42 = vsel %vm5337_vm4, %v2780_v52, %v2784_v27  ;;  %v2808_v55 = vrot.slane %v2807_v8, 4  ;;  %v5121_v52 = vld [vmem:[%s6340_s3 + $0x150] sm:$0xff]   ;;  %v6177_v49 = vpop.f32.mrb[7].mxu1  ;;  %v5122_v27 = vld [vmem:[%s6340_s3 + $0x158] sm:$0xff]  }
 0x1c6   : > { %4769 = vmatprep.subr.bf16.mxu1 %v5116_v48  ;;  %v6142_v12 = vcombine.low %v3406_v20, %v3420_v25  ;;  %v4192_v60 = vcombine.low %v2743_v28, %v2757_v9  ;;  %v4193_v13 = vcombine.low %v2771_v53, %v2785_v42  ;;  %v4204_v14 = vrot.slane %v2969_v51, 9  ;;  %v5123_v25 = vld [vmem:[%s6340_s3 + $0x160] sm:$0xff]   ;;  %v5125_v42 = vld [vmem:[%s6340_s3 + $0x170] sm:$0xff]   ;;  %v2970_v51 = vld [vmem:[#allocation2 + $0x18] sm:$0xe] }
 0x1c7   : > { %4860 = vmatpush3.bf16.msra.mxu0 %v6087_v29  ;;  %v2798_v5 = vrot.slane %v2796_v59, 5  ;;  %v2813_v21 = vsel %vm5337_vm4, %v2808_v55, %v2812_v46  ;;  %v3670_v18 = vsel %vm5799_vm13, %v4298_v50, %v3669_v30  ;;  %v2995_v24 = vsel %vm5799_vm13, %v4203_v0, %v2994_v7  ;;  %v2971_v28 = vld [vmem:[#allocation2 + $0x20] sm:$0xe] }
 0x1c8   : > { %4861 = vmatprep.subr.bf16.mxu0 %v6107_v54  ;;  %v2999_v44 = vsel %vm5799_vm13, %v4204_v14, %v2998_v15  ;;  %v3006_v53 = vrot.slane %v5985_v6, 5  ;;  %v4208_v57 = vrot.slane %v2973_v40, 9  ;;  %v4205_v59 = vrot.slane %v2970_v51, 9  ;;  %v2975_v50 = vld [vmem:[#allocation2 + $0x40] sm:$0xe] }
 0x1c9   : > { %4770 = vmatpush3.bf16.msra.mxu1 %v5116_v48  ;;  %v3633_v48 = vld [vmem:[#allocation2 + $0x20] sm:$0xe]  ;;  %v4227_v8 = vcombine.low %v2995_v24, %v2999_v44  ;;  %v3002_v55 = vrot.slane %v6008_v19, 5  ;;  %v3010_v14 = vrot.slane %v6015_v56, 5  ;;  %v5128_v56 = vld [vmem:[%s6340_s3 + $0x188] sm:$0xff]   ;;  %v3022_v0 = vrot.slane %v6120_v41, 5 }
 0x1ca   : > { %4779 = vmatprep.subr.bf16.mxu1 %v5118_v17  ;;  %v4297_v47 = vrot.slane %v3633_v48, 9  ;;  %v5131_v41 = vld [vmem:[%s6340_s3 + $0x198] sm:$0xff]   ;;  %v5143_v40 = vld [vmem:[%s6340_s3 + $0x1e0] sm:$0xff]  }
 0x1cb   : > { %4862 = vmatpush3.bf16.msra.mxu0 %v6107_v54  ;;  %v5135_v24 = vld [vmem:[%s6340_s3 + $0x1b8] sm:$0xff]  }
 0x1cc   : > { %4863 = vmatprep.subr.bf16.mxu0 %v6134_v23  ;;  %4772 = vmatmul.mubr.bf16.vlgmr.msra.gmra.mrb[8].mxu1 %v4192_v60  ;;  %v3666_v9 = vsel %vm5799_vm13, %v4297_v47, %v3665_v45  ;;  %v4206_v60 = vrot.slane %v2971_v28, 9  ;;  %v3018_v47 = vrot.slane %v6140_v35, 5  ;;  %v5129_v45 = vld [vmem:[%s6340_s3 + $0x190] sm:$0xff]   ;;  %v5132_v35 = vld [vmem:[%s6340_s3 + $0x1a0] sm:$0xff]  }
 0x1cd   : > { %4775 = vmatprep.mubr.bf16.mxu1 %v4193_v13  ;;  %4780 = vmatpush3.bf16.msra.mxu1 %v5118_v17  ;;  %v2799_v17 = vsel %vm5337_vm4, %v2794_v36, %v2798_v5  ;;  %v4320_v20 = vcombine.low %v3666_v9, %v3670_v18  ;;  %v3014_v13 = vrot.slane %v6020_v11, 5  ;;  %v3003_v11 = vsel %vm5799_vm13, %v4205_v59, %v3002_v55  ;;  %v2974_v36 = vld [vmem:[#allocation2 + $0x38] sm:$0xe]  ;;  %v5136_v9 = vld [vmem:[#allocation2 + $0x20] ss:$8 sps:$4 sm:$0xff]  }
 0x1ce   : > { %4781 = vmatprep.subr.bf16.mxu1 %v5120_v32  ;;  %v4194_v31 = vcombine.low %v2799_v17, %v2813_v21  ;;  %v3007_v15 = vsel %vm5799_vm13, %v4206_v60, %v3006_v53  ;;  %v4209_v7 = vrot.slane %v2974_v36, 9  ;;  %v5130_v18 = vld [vmem:[#allocation2 + $0x10] ss:$8 sps:$4 sm:$0xff]   ;;  %v5133_v17 = vld [vmem:[%s6340_s3 + $0x1a8] sm:$0xff]  }
 0x1cf   : > { %4864 = vmatpush3.bf16.msra.mxu0 %v6134_v23  ;;  %v3015_v6 = vsel %vm5799_vm13, %v4208_v57, %v3014_v13  ;;  %v4228_v19 = vcombine.low %v3003_v11, %v3007_v15  ;;  %v3357_v28 = vld [vmem:[#allocation2 + $0x30] sm:$0xf]  ;;  %v5144_v53 = vld [vmem:[%s6340_s3 + $0x1e8] sm:$0xff]   ;;  %v3358_v15 = vld [vmem:[#allocation2 + $0x34] sm:$0x1] }
 0x1d0   : > { %4865 = vmatprep.subr.bf16.mxu0 %v6159_v34  ;;  %v3019_v21 = vsel %vm5799_vm13, %v4209_v7, %v3018_v47  ;;  %v3422_v51 = vshrl.u32 %v3357_v28, 16  ;;  %v3425_v60 = vshll.u32 %v3357_v28, 16  ;;  %v3363_v55 = vld [vmem:[#allocation2 + $0x48] sm:$0xf]  ;;  %v5146_v36 = vld [vmem:[%s6340_s3 + $0x1f8] sm:$0xff]  }
 0x1d1   : > { %4782 = vmatpush3.bf16.msra.mxu1 %v5120_v32  ;;  %v2972_v32 = vld [vmem:[#allocation2 + $0x28] sm:$0xe]  ;;  %v3464_v11 = vshrl.u32 %v3363_v55, 16 }
 0x1d2   : > { %4783 = vmatprep.subr.bf16.mxu1 %v5121_v52  ;;  %v4207_v48 = vrot.slane %v2972_v32, 9  ;;  %v3424_v13 = vrot.slane %v3422_v51, 4  ;;  %v3427_v59 = vrot.slane %v3425_v60, 5  ;;  %v3673_v60 = vrot.slane %v3358_v15, 5 }
 0x1d3   : > { %4866 = vmatpush3.bf16.msra.mxu0 %v6159_v34  ;;  %v3466_v47 = vrot.slane %v3464_v11, 4 }
 0x1d4   : > { %4776 = vmatmul.mubr.bf16.gmra.mrb[12].mxu1 %v4194_v31  ;;  %v3011_v30 = vsel %vm5799_vm13, %v4207_v48, %v3010_v14  ;;  %v5134_v31 = vld [vmem:[%s6340_s3 + $0x1b0] sm:$0xff]  }
 0x1d5   : > { %4784 = vmatpush3.bf16.msra.mxu1 %v5121_v52  ;;  %4795 = vmatprep.mubr.bf16.mxu1 %v4227_v8  ;;  %v4229_v46 = vcombine.low %v3011_v30, %v3015_v6  ;;  %v4210_v52 = vrot.slane %v2975_v50, 9  ;;  %v5139_v8 = vld [vmem:[%s6340_s3 + $0x1c8] sm:$0xff]   ;;  %v3428_v30 = vor.u32 %v3427_v59, %v3424_v13 }
 0x1d6   : > { %4868 = vmatmul.mubr.bf16.vlgmr.msra.gmra.mrb[16].mxu0 %v4320_v20  ;;  %4785 = vmatprep.subr.bf16.mxu1 %v5122_v27  ;;  %v5138_v20 = vld [vmem:[#allocation2 + $0x30] ss:$8 sps:$4 sm:$0xff]  }
 0x1d7   : > { %v3023_v5 = vsel %vm5799_vm13, %v4210_v52, %v3022_v0 }
 0x1d8   : > { %v4230_v44 = vcombine.low %v3019_v21, %v3023_v5  ;;  %v3429_v5 = vrot.slane %v3428_v30, 4 }
 0x1d9   : > { %4786 = vmatpush3.bf16.msra.mxu1 %v5122_v27  ;;  %v5137_v27 = vld [vmem:[%s6340_s3 + $0x1c0] sm:$0xff]  }
 0x1da   : > { %4787 = vmatprep.subr.bf16.mxu1 %v5123_v25 }
 0x1dd   : > { %4788 = vmatpush3.bf16.msra.mxu1 %v5123_v25  ;;  %v5141_v25 = vld [vmem:[%s6340_s3 + $0x1d0] sm:$0xff]  }
 0x1de   : > { %4789 = vmatprep.subr.bf16.mxu1 %v5124_v33 }
 0x1e1   : > { %4790 = vmatpush3.bf16.msra.mxu1 %v5124_v33  ;;  %v5140_v33 = vld [vmem:[#allocation2 + $0x40] ss:$8 sps:$4 sm:$0xff]  }
 0x1e2   : > { %4791 = vmatprep.subr.bf16.mxu1 %v5125_v42 }
 0x1e5   : > { %4792 = vmatpush3.bf16.msra.mxu1 %v5125_v42  ;;  %v5142_v42 = vld [vmem:[%s6340_s3 + $0x1d8] sm:$0xff]  }
 0x1e6   : > { %4793 = vmatprep.subr.bf16.mxu1 %v5126_v22 }
 0x1e9   : > { %4794 = vmatpush3.bf16.msra.mxu1 %v5126_v22  ;;  %v3359_v22 = vld [vmem:[#allocation2 + $0x38] sm:$0xf] }
 0x1ea   : > { %4803 = vmatprep.subr.bf16.mxu1 %v5127_v26  ;;  %v3436_v32 = vshrl.u32 %v3359_v22, 16  ;;  %v3439_v57 = vshll.u32 %v3359_v22, 16  ;;  %v3636_v22 = vld [vmem:[#allocation2 + $0x38] sm:$0xe] }
 0x1ec   : > { %4796 = vmatmul.mubr.bf16.vlgmr.msra.gmra.mrb[8].mxu1 %v4228_v19  ;;  %v3438_v48 = vrot.slane %v3436_v32, 4  ;;  %v3441_v14 = vrot.slane %v3439_v57, 5  ;;  %v3467_v19 = vshll.u32 %v3363_v55, 16  ;;  %v4300_v32 = vrot.slane %v3636_v22, 9 }
 0x1ed   : > { %4799 = vmatprep.mubr.bf16.mxu1 %v4229_v46  ;;  %4804 = vmatpush3.bf16.msra.mxu1 %v5127_v26  ;;  %v5145_v26 = vld [vmem:[%s6340_s3 + $0x1f0] sm:$0xff]   ;;  %v3431_v46 = vshll.u32 %v3358_v15, 16 }
 0x1ee   : > { %4805 = vmatprep.subr.bf16.mxu1 %v5128_v56  ;;  %v3442_v52 = vor.u32 %v3441_v14, %v3438_v48 }
 0x1f1   : > { %4806 = vmatpush3.bf16.msra.mxu1 %v5128_v56  ;;  %v3360_v56 = vld [vmem:[#allocation2 + $0x3c] sm:$0x1] }
 0x1f2   : > { %4807 = vmatprep.subr.bf16.mxu1 %v5129_v45  ;;  %v3445_v21 = vshll.u32 %v3360_v56, 16  ;;  %v3677_v57 = vrot.slane %v3360_v56, 5 }
 0x1f4   : > { %4800 = vmatmul.mubr.bf16.gmra.mrb[12].mxu1 %v4230_v44  ;;  %v3433_v44 = vrot.slane %v3431_v46, 5 }
 0x1f5   : > { %4808 = vmatpush3.bf16.msra.mxu1 %v5129_v45  ;;  %4819 = vmatprep.mubr.bf16.mxu1 %v5130_v18  ;;  %v3469_v45 = vrot.slane %v3467_v19, 5  ;;  %v3362_v18 = vld [vmem:[#allocation2 + $0x44] sm:$0x1] }
 0x1f6   : > { %4809 = vmatprep.subr.bf16.mxu1 %v5131_v41 }
 0x1f9   : > { %4810 = vmatpush3.bf16.msra.mxu1 %v5131_v41  ;;  %v3443_v41 = vrot.slane %v3442_v52, 4 }
 0x1fa   : > { %4811 = vmatprep.subr.bf16.mxu1 %v5132_v35 }
 0x1fd   : > { %4812 = vmatpush3.bf16.msra.mxu1 %v5132_v35  ;;  %v3364_v35 = vld [vmem:[#allocation2 + $0x4c] sm:$0x1] }
 0x1fe   : > { %4813 = vmatprep.subr.bf16.mxu1 %v5133_v17  ;;  %v3685_v48 = vrot.slane %v3364_v35, 5 }
 0x201   : > { %4814 = vmatpush3.bf16.msra.mxu1 %v5133_v17 }
 0x202   : > { %4815 = vmatprep.subr.bf16.mxu1 %v5134_v31 }
 0x205   : > { %4816 = vmatpush3.bf16.msra.mxu1 %v5134_v31  ;;  %v3470_v31 = vor.u32 %v3469_v45, %v3466_v47 }
 0x206   : > { %4817 = vmatprep.subr.bf16.mxu1 %v5135_v24 }
 0x207   : > { %v3471_v28 = vrot.slane %v3470_v31, 4 }
 0x209   : > { %4818 = vmatpush3.bf16.msra.mxu1 %v5135_v24  ;;  %v3473_v24 = vshll.u32 %v3364_v35, 16 }
 0x20a   : > { %4827 = vmatprep.subr.bf16.mxu1 %v5137_v27 }
 0x20c   : > { %4820 = vmatmul.mubr.bf16.vlgmr.msra.gmra.mrb[8].mxu1 %v5136_v9  ;;  %v3447_v9 = vrot.slane %v3445_v21, 5 }
 0x20d   : > { %4823 = vmatprep.mubr.bf16.mxu1 %v5138_v20  ;;  %4828 = vmatpush3.bf16.msra.mxu1 %v5137_v27  ;;  %v3434_v27 = vsel %vm5337_vm4, %v3429_v5, %v3433_v44  ;;  %v3635_v20 = vld [vmem:[#allocation2 + $0x30] sm:$0xe] }
 0x20e   : > { %4829 = vmatprep.subr.bf16.mxu1 %v5139_v8  ;;  %v4299_v51 = vrot.slane %v3635_v20, 9 }
 0x211   : > { %4830 = vmatpush3.bf16.msra.mxu1 %v5139_v8  ;;  %v3459_v8 = vshll.u32 %v3362_v18, 16 }
 0x212   : > { %4831 = vmatprep.subr.bf16.mxu1 %v5141_v25 }
 0x214   : > { %4824 = vmatmul.mubr.bf16.gmra.mrb[12].mxu1 %v5140_v33 }
 0x215   : > { %4832 = vmatpush3.bf16.msra.mxu1 %v5141_v25  ;;  %4843 = vmatprep.mubr.bf16.mxu1 %v6111_v43  ;;  %v3361_v43 = vld [vmem:[#allocation2 + $0x40] sm:$0xf]  ;;  %v3448_v25 = vsel %vm5337_vm4, %v3443_v41, %v3447_v9 }
 0x216   : > { %4833 = vmatprep.subr.bf16.mxu1 %v5142_v42  ;;  %v3450_v6 = vshrl.u32 %v3361_v43, 16  ;;  %v3453_v50 = vshll.u32 %v3361_v43, 16  ;;  %v4285_v33 = vcombine.low %v3434_v27, %v3448_v25  ;;  %v3674_v43 = vsel %vm5799_vm13, %v4299_v51, %v3673_v60 }
 0x218   : > { %v3452_v0 = vrot.slane %v3450_v6, 4  ;;  %v3455_v7 = vrot.slane %v3453_v50, 5 }
 0x219   : > { %4834 = vmatpush3.bf16.msra.mxu1 %v5142_v42 }
 0x21a   : > { %4835 = vmatprep.subr.bf16.mxu1 %v5143_v40  ;;  %v3456_v17 = vor.u32 %v3455_v7, %v3452_v0 }
 0x21c   : > { %v3457_v42 = vrot.slane %v3456_v17, 4 }
 0x21d   : > { %4836 = vmatpush3.bf16.msra.mxu1 %v5143_v40  ;;  %v3475_v40 = vrot.slane %v3473_v24, 5 }
 0x21e   : > { %4837 = vmatprep.subr.bf16.mxu1 %v5144_v53 }
 0x21f   : > { %v3476_v59 = vsel %vm5337_vm4, %v3471_v28, %v3475_v40 }
 0x221   : > { %4838 = vmatpush3.bf16.msra.mxu1 %v5144_v53  ;;  %v3461_v53 = vrot.slane %v3459_v8, 5 }
 0x222   : > { %4839 = vmatprep.subr.bf16.mxu1 %v5145_v26 }
 0x223   : > { %v3462_v13 = vsel %vm5337_vm4, %v3457_v42, %v3461_v53 }
 0x225   : > { %4840 = vmatpush3.bf16.msra.mxu1 %v5145_v26  ;;  %v3681_v26 = vrot.slane %v3362_v18, 5 }
 0x226   : > { %4841 = vmatprep.subr.bf16.mxu1 %v5146_v36 }
 0x229   : > { %4842 = vmatpush3.bf16.msra.mxu1 %v5146_v36 }
 0x22a   : > { %4875 = vmatprep.subr.bf16.mxu1 %v5979_v10 }
 0x22c   : > { %4844 = vmatmul.mubr.bf16.vlgmr.msra.gmra.mrb[8].mxu1 %v6142_v12  ;;  %v4286_v12 = vcombine.low %v3462_v13, %v3476_v59 }
 0x22d   : > { %4847 = vmatprep.mubr.bf16.mxu1 %v4285_v33  ;;  %4883 = vmatpush3.bf16.msra.mxu1 %v5979_v10  ;;  %v3678_v10 = vsel %vm5799_vm13, %v4300_v32, %v3677_v57 }
 0x22e   : > { %4876 = vmatprep.subr.bf16.mxu1 %v5998_v3  ;;  %v4321_v55 = vcombine.low %v3674_v43, %v3678_v10 }
 0x231   : > { %4884 = vmatpush3.bf16.msra.mxu1 %v5998_v3  ;;  %v3638_v3 = vld [vmem:[#allocation2 + $0x48] sm:$0xe] }
 0x232   : > { %4877 = vmatprep.subr.bf16.mxu1 %v6037_v1  ;;  %v4302_v14 = vrot.slane %v3638_v3, 9 }
 0x234   : > { %4848 = vmatmul.mubr.bf16.gmra.mrb[12].mxu1 %v4286_v12 }
 0x235   : > { %4885 = vmatpush3.bf16.msra.mxu1 %v6037_v1  ;;  %4871 = vmatprep.mubr.bf16.mxu1 %v4321_v55  ;;  %v4301_v1 = vrot.slane %v3637_v58, 9 }
 0x236   : > { %4878 = vmatprep.subr.bf16.mxu1 %v6061_v16 }
 0x239   : > { %4886 = vmatpush3.bf16.msra.mxu1 %v6061_v16  ;;  %v3682_v16 = vsel %vm5799_vm13, %v4301_v1, %v3681_v26 }
 0x23a   : > { %4879 = vmatprep.subr.bf16.mxu1 %v6087_v29 }
 0x23d   : > { %4887 = vmatpush3.bf16.msra.mxu1 %v6087_v29  ;;  %v3686_v29 = vsel %vm5799_vm13, %v4302_v14, %v3685_v48 }
 0x23e   : > { %4880 = vmatprep.subr.bf16.mxu1 %v6107_v54  ;;  %v4322_v15 = vcombine.low %v3682_v16, %v3686_v29 }
 0x241   : > { %4888 = vmatpush3.bf16.msra.mxu1 %v6107_v54  ;;  %v4066_v54 = vld [vmem:[%s6343_s6] ss:$0 sm:$0xff] }
 0x242   : > { %4881 = vmatprep.subr.bf16.mxu1 %v6134_v23  ;;  %v1854_v6 = vadd.f32 %v6066_v4, %v4066_v54  ;;  %v1857_v11 = vadd.f32 %v6081_v63, %v4066_v54  ;;  %v1849_v2 = vadd.f32 %v4066_v54, %v6090_v61  ;;  %v1870_v0 = vadd.f32 %v6162_v39, %v4066_v54 }
 0x243   : > { %v1862_v7 = vadd.f32 %v4066_v54, %v6165_v62  ;;  %v1873_v4 = vadd.f32 %v6171_v38, %v4066_v54  ;;  %v1865_v63 = vadd.f32 %v4066_v54, %v6177_v49  ;;  %v4331_v38 = vld [vmem:[%s6341_s4] ss:$0 sm:$0xff] }
 0x245   : > { %4889 = vmatpush3.bf16.msra.mxu1 %v6134_v23  ;;  %v1846_v23 = vadd.f32 %v4066_v54, %v6078_v37 }
 0x246   : > { %4882 = vmatprep.subr.bf16.mxu1 %v6159_v34 }
 0x249   : > { %4890 = vmatpush3.bf16.msra.mxu1 %v6159_v34 }
 0x24c   : > { %4872 = vmatmul.mubr.bf16.vlgmr.msra.gmra.mrb[12].mxu1 %v4322_v15 }
 0x289   : > { %v4701_v50 = vpop.f32.mrb[8].mxu0 }
 0x28a   : > { %v4892_v19 = vadd.f32 %v4701_v50, %v1854_v6  ;;  %v2272_v30 = vpop.f32.mrb[9].mxu0 }
 0x28b   : > { %v4897_v56 = vadd.f32 %v2272_v30, %v1846_v23  ;;  %v4702_v36 = vpop.f32.mrb[10].mxu0 }
 0x28c   : > { %v4902_v34 = vadd.f32 %v4702_v36, %v1857_v11  ;;  %v2275_v46 = vpop.f32.mrb[11].mxu0 }
 0x28d   : > { %v4907_v52 = vadd.f32 %v2275_v46, %v1849_v2 }
 0x291   : > { %v4705_v47 = vpop.f32.mrb[12].mxu0 }
 0x292   : > { %v4912_v37 = vadd.f32 %v4705_v47, %v1870_v0  ;;  %v2288_v45 = vpop.f32.mrb[13].mxu0 }
 0x293   : > { %v4916_v5 = vadd.f32 %v2288_v45, %v1862_v7  ;;  %v4706_v21 = vpop.f32.mrb[14].mxu0 }
 0x294   : > { %v4920_v61 = vadd.f32 %v4706_v21, %v1873_v4  ;;  %v2291_v44 = vpop.f32.mrb[15].mxu0 }
 0x295   : > { %v4924_v41 = vadd.f32 %v2291_v44, %v1865_v63 }
 0x2a9   : > { %v4869_v18 = vpop.f32.mrb[16].mxu0 }
 0x2aa   : > { %v3802_v35 = vpop.f32.mrb[17].mxu0 }
 0x2ab   : > { %v4870_v17 = vpop.f32.mrb[18].mxu0 }
 0x2ac   : > { %v3805_v31 = vpop.f32.mrb[19].mxu0 }
 0x2ff   : > { %v4845_v39 = vpop.f32.mrb[8].mxu1 }
 0x300   : > { %v4893_v24 = vadd.f32 %v4892_v19, %v4845_v39  ;;  %v3592_v62 = vpop.f32.mrb[9].mxu1 }
 0x301   : > { %v4898_v27 = vadd.f32 %v4897_v56, %v3592_v62  ;;  %v4846_v9 = vpop.f32.mrb[10].mxu1 }
 0x302   : > { %v4894_v49 = vadd.f32 %v4893_v24, %v4869_v18  ;;  %v4903_v8 = vadd.f32 %v4902_v34, %v4846_v9  ;;  %v3595_v20 = vpop.f32.mrb[11].mxu1 }
 0x303   : > { %v4899_v25 = vadd.f32 %v4898_v27, %v3802_v35  ;;  %v4908_v33 = vadd.f32 %v4907_v52, %v3595_v20 }
 0x304   : > { %v4895_v42 = vadd.f32 %v4894_v49, %v4331_v38  ;;  %v4904_v28 = vadd.f32 %v4903_v8, %v4870_v17 }
 0x305   : > { %v4900_v40 = vadd.f32 %v4899_v25, %v4331_v38  ;;  %v4909_v22 = vadd.f32 %v4908_v33, %v3805_v31 }
 0x306   : > { %v3866_v51 = vmax.f32 %v4895_v42, 0.0  ;;  %v4905_v60 = vadd.f32 %v4904_v28, %v4331_v38 }
 0x307   : > { %v3864_v53 = vmax.f32 %v4900_v40, 0.0  ;;  %v4910_v32 = vadd.f32 %v4909_v22, %v4331_v38 }
 0x308   : > { %3874 = vst [vmem:[%s6324_s12 + $0x10] sm:$0xff] %v3866_v51  ;;  %v3867_v57 = vmax.f32 %v4905_v60, 0.0 }
 0x309   : > { %3872 = vst [vmem:[%s6324_s12] sm:$0xff] %v3864_v53  ;;  %v3865_v13 = vmax.f32 %v4910_v32, 0.0 }
 0x30a   : > { %3875 = vst [vmem:[%s6324_s12 + $0x18] sm:$0xff] %v3867_v57 }
 0x30b   : > { %3873 = vst [vmem:[%s6324_s12 + $0x8] sm:$0xff] %v3865_v13 }
 0x31f   : > { %v4873_v59 = vpop.f32.mrb[12].mxu1 }
 0x320   : > { %v4913_v43 = vadd.f32 %v4912_v37, %v4873_v59  ;;  %v3818_v12 = vpop.f32.mrb[13].mxu1 }
 0x321   : > { %v4917_v10 = vadd.f32 %v4916_v5, %v3818_v12  ;;  %v4874_v55 = vpop.f32.mrb[14].mxu1 }
 0x322   : > { %v4914_v58 = vadd.f32 %v4913_v43, %v4331_v38  ;;  %v4921_v3 = vadd.f32 %v4920_v61, %v4874_v55  ;;  %v3821_v26 = vpop.f32.mrb[15].mxu1 }
 0x323   : > { %v4918_v48 = vadd.f32 %v4917_v10, %v4331_v38  ;;  %v4925_v1 = vadd.f32 %v4924_v41, %v3821_v26 }
 0x324   : > { %v3870_v14 = vmax.f32 %v4914_v58, 0.0  ;;  %v4922_v16 = vadd.f32 %v4921_v3, %v4331_v38 }
 0x325   : > { %v3868_v29 = vmax.f32 %v4918_v48, 0.0  ;;  %v4926_v15 = vadd.f32 %v4925_v1, %v4331_v38 }
 0x326   : > { %3878 = vst [vmem:[%s6324_s12 + $0x30] sm:$0xff] %v3870_v14  ;;  %v3871_v54 = vmax.f32 %v4922_v16, 0.0 }
 0x327   : > { %3876 = vst [vmem:[%s6324_s12 + $0x20] sm:$0xff] %v3868_v29  ;;  %v3869_v6 = vmax.f32 %v4926_v15, 0.0 }
 0x328   : > { %3879 = vst [vmem:[%s6324_s12 + $0x38] sm:$0xff] %v3871_v54 }
 0x329   : > { %3877 = vst [vmem:[%s6324_s12 + $0x28] sm:$0xff] %v3869_v6 }
 0x32a PF: > { %s17_s24 = sadd.s32 1, %s5153_s24  }
 0x32b   : > { %p14_p4 = scmp.ge.s32.totalorder %s17_s24, 4  }
 0x32d   :  { %16 = sbr.rel (!%p14_p4) target bundleno = 1 (0x1), region = 96 }

</bundles_post_ra>
